<compile_context>
chip_gen: v7x
topology: tpu7x:2x2x1
jax: 0.10.0
libtpu: 0.0.40
codegen_flags: <defaults>
</compile_context>

<pallas_src>
import functools

import jax
import jax.numpy as jnp
from jax import lax
from jax.experimental import pallas as pl
from jax.experimental.pallas import tpu as pltpu


def _round_up(x, m):
    return ((x + m - 1) // m) * m


def _chip_info():
    """Best-effort hardware query; only affects tiling heuristics, never correctness."""
    kind = ""
    try:
        kind = jax.devices()[0].device_kind.lower()
    except Exception:
        pass
    vmem_cap = 64 << 20  # conservative fallback (v7x per-TC capacity)
    try:
        vmem_cap = int(pltpu.get_tpu_info().vmem_capacity_bytes)
    except Exception:
        pass
    two_tc = "v7" in kind
    is_v5 = "v5" in kind
    return vmem_cap, two_tc, is_v5


def _gru_recurrence_kernel(xg_ref,      # (T_CHUNK, B_BLK, 3Hp)  precomputed x gates (f32)
                           w_h_ref,     # (Hp, 3Hp)              fused hidden weights (bf16)
                           b_hn_ref,    # (1, Hp)                n-gate hidden bias (f32)
                           h_all_ref,   # (T_CHUNK, B_BLK, Hp)   output: hidden state per step
                           h_carry_ref,  # (B_BLK, Hp) f32 scratch: hidden state across chunks
                           *, hidden_pad, unroll):
    """Sequential GRU recurrence for one batch block over one time chunk."""
    Hp = hidden_pad
    T_CHUNK, B_BLK, _ = xg_ref.shape

    # New batch block begins -> reset the carried hidden state to h0 = 0.
    @pl.when(pl.program_id(1) == 0)
    def _():
        h_carry_ref[...] = jnp.zeros_like(h_carry_ref)

    # Load weights once; hoist bias broadcast out of the time loop.
    w_h = w_h_ref[...]                                                   # bf16 (Hp, 3Hp)
    b_hn = jnp.broadcast_to(b_hn_ref[...], (B_BLK, Hp))                  # f32

    def step(t, h):
        xg_t = xg_ref[t]                                                 # (B_BLK, 3Hp) f32
        # One fused bf16 MXU push per step, f32 accumulation.
        hg = jnp.dot(h.astype(jnp.bfloat16), w_h,
                     preferred_element_type=jnp.float32)                 # (B_BLK, 3Hp)
        # sigmoid(x) = 0.5 * (1 + tanh(0.5 * x)): one EUP push instead of exp + recip.
        r = 0.5 * (1.0 + jnp.tanh(0.5 * (xg_t[:, 0:Hp] + hg[:, 0:Hp])))
        z = 0.5 * (1.0 + jnp.tanh(0.5 * (xg_t[:, Hp:2 * Hp] + hg[:, Hp:2 * Hp])))
        n = jnp.tanh(xg_t[:, 2 * Hp:3 * Hp] + r * (hg[:, 2 * Hp:3 * Hp] + b_hn))
        h_new = (1.0 - z) * n + z * h
        h_all_ref[t] = h_new.astype(h_all_ref.dtype)                     # lane-dense (Hp % 128 == 0)
        return h_new

    h_final = lax.fori_loop(0, T_CHUNK, step, h_carry_ref[...], unroll=unroll)
    h_carry_ref[...] = h_final


def gru_predictor_pallas(x, params):
    """x: (B, T, E) batch-first, float32. Returns (B, T, E), matching the PyTorch module."""
    B, T, E = x.shape
    H = params["w_hr"].shape[0]
    Hp = _round_up(H, 128)            # lane-align every gate slice / store
    vmem_cap, two_tc, is_v5 = _chip_info()
    vmem_limit = min((vmem_cap * 7) // 8, 100 << 20)

    # --- Fuse + pad gate parameters: (E, 3Hp) input matrix, (Hp, 3Hp) hidden matrix ---
    def pad_h(a):                      # pad last (gate) dim H -> Hp with zeros
        return jnp.pad(a, ((0, 0), (0, Hp - H))) if Hp != H else a

    # b_hr / b_hz are prefolded into the hoisted input projection (r and z just sum them);
    # only b_hn must stay inside the recurrence (scaled by r).
    w_i_cat = jnp.concatenate([pad_h(params["w_ir"]), pad_h(params["w_iz"]),
                               pad_h(params["w_in"])], axis=1)                       # (E, 3Hp)
    b_i_cat = jnp.concatenate([pad_h(params["b_ir"] + params["b_hr"]),
                               pad_h(params["b_iz"] + params["b_hz"]),
                               pad_h(params["b_in"])], axis=1)                        # (1, 3Hp)
    w_h_cat = jnp.concatenate([pad_h(params["w_hr"]), pad_h(params["w_hz"]),
                               pad_h(params["w_hn"])], axis=1)                        # (H, 3Hp)
    if Hp != H:
        w_h_cat = jnp.pad(w_h_cat, ((0, Hp - H), (0, 0)))                             # (Hp, 3Hp)
    w_h_bf16 = w_h_cat.astype(jnp.bfloat16)
    b_hn_p = pad_h(params["b_hn"])                                                     # (1, Hp)
    w_fc_p = (jnp.pad(params["w_fc"], ((0, Hp - H), (0, 0)))
              if Hp != H else params["w_fc"])                                          # (Hp, E)

    # --- Batch block size (grid axis 0, "parallel") ---
    b_cap = 256 if (B >= 256 and not is_v5) else 128      # v6e/v7x MXUs are 256-row
    B_BLK = min(b_cap, _round_up(B, 8))
    if two_tc and _round_up(B, B_BLK) // B_BLK == 1 and B >= 16:
        B_BLK = _round_up((B + 1) // 2, 8)                 # feed both TensorCores on v7x
    Bp = _round_up(B, B_BLK)
    nb = Bp // B_BLK

    # --- Time chunk size (grid axis 1, "arbitrary") from the VMEM budget ---
    budget = int(vmem_limit * 0.7)                          # headroom for compiler temporaries
    fixed = 2 * (Hp * 3 * Hp * 2) + 2 * (Hp * 4) + B_BLK * Hp * 4   # weights + bias + carry
    per_t = 2 * B_BLK * (3 * Hp + Hp) * 4                   # double-buffered xg + h chunks (f32)
    T_CHUNK = int(max(1, min(T, (budget - fixed) // per_t)))
    Tp = _round_up(T, T_CHUNK)
    ntc = Tp // T_CHUNK

    # --- Pad x (cheap) rather than the (T, B, 3Hp) slab, then hoist the input-gate GEMM ---
    if (Bp, Tp) != (B, T):
        x = jnp.pad(x, ((0, Bp - B), (0, Tp - T), (0, 0)))
    xg = jnp.einsum("bte,eg->tbg", x, w_i_cat,
                    preferred_element_type=jnp.float32) + b_i_cat        # (Tp, Bp, 3Hp)

    kernel = functools.partial(_gru_recurrence_kernel,
                               hidden_pad=Hp, unroll=int(min(T_CHUNK, 8)))

    h_all = pl.pallas_call(
        kernel,
        out_shape=jax.ShapeDtypeStruct((Tp, Bp, Hp), jnp.float32),
        grid=(nb, ntc),
        in_specs=[
            pl.BlockSpec((T_CHUNK, B_BLK, 3 * Hp), lambda b, t: (t, b, 0)),  # x-gate chunk
            pl.BlockSpec((Hp, 3 * Hp), lambda b, t: (0, 0)),                 # fused hidden weights
            pl.BlockSpec((1, Hp), lambda b, t: (0, 0)),                      # b_hn
        ],
        out_specs=pl.BlockSpec((T_CHUNK, B_BLK, Hp), lambda b, t: (t, b, 0)),
        scratch_shapes=[pltpu.VMEM((B_BLK, Hp), jnp.float32)],               # carried hidden state
        compiler_params=pltpu.CompilerParams(
            dimension_semantics=("parallel", "arbitrary"),
            vmem_limit_bytes=int(vmem_limit),
        ),
    )(xg, w_h_bf16, b_hn_p)

    # --- Hoisted fc projection: one (T*B, Hp) x (Hp, E) GEMM, emitted batch-first ---
    # TODO(synk): on v5e, optionally fuse fc per time chunk inside the kernel to avoid the
    # h_all HBM round trip (lane-dense per-chunk GEMM, not per-step).
    out = jnp.einsum("tbh,he->bte", h_all[:T, :B, :], w_fc_p,
                     preferred_element_type=jnp.float32) + params["b_fc"][0]
    return out


def gru_predictor_ref(x, params):
    """Pure-JAX reference (lax.scan) with identical semantics (full f32)."""
    B, T, E = x.shape
    H = params["w_hr"].shape[0]

    def step(h, x_t):
        r = jax.nn.sigmoid(x_t @ params["w_ir"] + params["b_ir"][0]
                           + h @ params["w_hr"] + params["b_hr"][0])
        z = jax.nn.sigmoid(x_t @ params["w_iz"] + params["b_iz"][0]
                           + h @ params["w_hz"] + params["b_hz"][0])
        n = jnp.tanh(x_t @ params["w_in"] + params["b_in"][0]
                     + r * (h @ params["w_hn"] + params["b_hn"][0]))
        h_new = (1.0 - z) * n + z * h
        y = h_new @ params["w_fc"] + params["b_fc"][0]
        return h_new, y

    h0 = jnp.zeros((B, H), jnp.float32)
    _, ys = lax.scan(step, h0, jnp.transpose(x, (1, 0, 2)))
    return jnp.transpose(ys, (1, 0, 2))


def init_params(key, embedding_dim, hidden_dim):
    """Deterministic init matching nn.GRU / nn.Linear shapes (uniform +-1/sqrt(H)).

    Weights are stored transposed per gate: w_i* (E,H), w_h* (H,H), w_fc (H,E).
    Biases are kept separate exactly like PyTorch (b_ir/b_iz/b_in and b_hr/b_hz/b_hn).
    """
    E, H = embedding_dim, hidden_dim
    k = 1.0 / jnp.sqrt(jnp.float32(H))
    keys = jax.random.split(key, 14)
    u = lambda kk, shape: jax.random.uniform(kk, shape, jnp.float32, -k, k)
    return {
        "w_ir": u(keys[0], (E, H)), "w_iz": u(keys[1], (E, H)), "w_in": u(keys[2], (E, H)),
        "w_hr": u(keys[3], (H, H)), "w_hz": u(keys[4], (H, H)), "w_hn": u(keys[5], (H, H)),
        "b_ir": u(keys[6], (1, H)), "b_iz": u(keys[7], (1, H)), "b_in": u(keys[8], (1, H)),
        "b_hr": u(keys[9], (1, H)), "b_hz": u(keys[10], (1, H)), "b_hn": u(keys[11], (1, H)),
        "w_fc": u(keys[12], (H, E)),   # Linear(H, E), stored transposed
        "b_fc": u(keys[13], (1, E)),
    }


if __name__ == "__main__":
    B, T, E, H = 2, 8, 16, 32  # batch, seq, embedding_dim, hidden_dim (small demo shapes)
    key = jax.random.PRNGKey(0)
    kx, kp = jax.random.split(key)
    x = jax.random.normal(kx, (B, T, E), jnp.float32)
    params = init_params(kp, E, H)

    out = jax.block_until_ready(gru_predictor_pallas(x, params))
    ref = jax.block_until_ready(gru_predictor_ref(x, params))

    assert out.shape == (B, T, E), out.shape
    # Tolerance loosened vs f32 reference because the per-step hidden matmul runs in bf16
    # (f32 accumulation); structural bugs would show O(0.1-1) errors.
    err = float(jnp.max(jnp.abs(out - ref)))
    assert jnp.allclose(out, ref, atol=3e-2, rtol=3e-2), err
    print("KERNEL_OK")
</pallas_src>

<mosaic_0001>
module attributes {stable_mosaic.version = 11 : i64} {
  func.func @_gru_recurrence_kernel(%arg0: i32, %arg1: i32, %arg2: memref<8x8x384xf32, #tpu.memory_space<vmem>>, %arg3: memref<128x384xbf16, #tpu.memory_space<vmem>>, %arg4: memref<1x128xf32, #tpu.memory_space<vmem>>, %arg5: memref<8x8x128xf32, #tpu.memory_space<vmem>>, %arg6: memref<8x128xf32, #tpu.memory_space<vmem>>) attributes {dimension_semantics = [#tpu.dimension_semantics<parallel>, #tpu.dimension_semantics<arbitrary>], iteration_bounds = array<i64: 1, 1>, scalar_prefetch = 0 : i64, scratch_operands = 1 : i64, tpu.core_type = #tpu.core_type<tc>, window_params = [{transform_indices = @transform_0, window_bounds = array<i64: 8, 8, 384>}, {pipeline_mode = #tpu.pipeline_mode<synchronous>, transform_indices = @transform_1, window_bounds = array<i64: 128, 384>}, {pipeline_mode = #tpu.pipeline_mode<synchronous>, transform_indices = @transform_2, window_bounds = array<i64: 1, 128>}, {transform_indices = @transform_3, window_bounds = array<i64: 8, 8, 128>}]} {
    %c0_i32 = arith.constant 0 : i32
    %0 = arith.cmpi eq, %arg1, %c0_i32 : i32
    %1 = arith.extui %0 : i1 to i32
    %c0_i32_0 = arith.constant 0 : i32
    %2 = arith.cmpi ne, %1, %c0_i32_0 : i32
    scf.if %2 {
      %cst_104 = arith.constant 0.000000e+00 : f32
      %329 = vector.broadcast %cst_104 : f32 to vector<8x128xf32>
      %c0_105 = arith.constant 0 : index
      %c0_106 = arith.constant 0 : index
      %330 = vector.load %arg6[%c0_105, %c0_106] : memref<8x128xf32, #tpu.memory_space<vmem>>, vector<8x128xf32>
      tpu.vector_store %arg6[%c0_105, %c0_106], %329 {strides = array<i32>} : memref<8x128xf32, #tpu.memory_space<vmem>>, vector<8x128xf32>,
    } else {
    }
    %c0 = arith.constant 0 : index
    %c0_1 = arith.constant 0 : index
    %3 = vector.load %arg3[%c0, %c0_1] : memref<128x384xbf16, #tpu.memory_space<vmem>>, vector<128x384xbf16>
    %c0_2 = arith.constant 0 : index
    %c0_3 = arith.constant 0 : index
    %4 = vector.load %arg4[%c0_2, %c0_3] : memref<1x128xf32, #tpu.memory_space<vmem>>, vector<1x128xf32>
    %5 = vector.shape_cast %4 : vector<1x128xf32> to vector<1x128xf32>
    %6 = vector.broadcast %5 : vector<1x128xf32> to vector<8x128xf32>
    %c0_4 = arith.constant 0 : index
    %c0_5 = arith.constant 0 : index
    %7 = vector.load %arg6[%c0_4, %c0_5] : memref<8x128xf32, #tpu.memory_space<vmem>>, vector<8x128xf32>
    %c0_i32_6 = arith.constant 0 : i32
    %8 = arith.index_cast %c0_i32_6 : i32 to index
    %c0_7 = arith.constant 0 : index
    %c0_8 = arith.constant 0 : index
    %9 = vector.load %arg2[%8, %c0_7, %c0_8] : memref<8x8x384xf32, #tpu.memory_space<vmem>>, vector<1x8x384xf32>
    %10 = vector.shape_cast %9 : vector<1x8x384xf32> to vector<8x384xf32>
    %11 = arith.truncf %7 : vector<8x128xf32> to vector<8x128xbf16>
    %cst = arith.constant dense<0.000000e+00> : vector<8x384xf32>
    %12 = tpu.matmul %11, %3, %cst {dimension_numbers = #tpu.dot_dimension_numbers<[1], [0], [0], [1], [0, 0, 1, 1], [], []>} : vector<8x128xbf16>, vector<128x384xbf16>, vector<8x384xf32> -> vector<8x384xf32>
    %13 = vector.extract_strided_slice %10 {offsets = [0, 0], sizes = [8, 128], strides = [1, 1]} : vector<8x384xf32> to vector<8x128xf32>
    %14 = vector.extract_strided_slice %12 {offsets = [0, 0], sizes = [8, 128], strides = [1, 1]} : vector<8x384xf32> to vector<8x128xf32>
    %15 = arith.addf %13, %14 : vector<8x128xf32>
    %cst_9 = arith.constant 5.000000e-01 : f32
    %16 = vector.broadcast %cst_9 : f32 to vector<8x128xf32>
    %17 = arith.mulf %16, %15 : vector<8x128xf32>
    %18 = math.tanh %17 : vector<8x128xf32>
    %cst_10 = arith.constant 1.000000e+00 : f32
    %19 = vector.broadcast %cst_10 : f32 to vector<8x128xf32>
    %20 = arith.addf %19, %18 : vector<8x128xf32>
    %cst_11 = arith.constant 5.000000e-01 : f32
    %21 = vector.broadcast %cst_11 : f32 to vector<8x128xf32>
    %22 = arith.mulf %21, %20 : vector<8x128xf32>
    %23 = vector.extract_strided_slice %10 {offsets = [0, 128], sizes = [8, 128], strides = [1, 1]} : vector<8x384xf32> to vector<8x128xf32>
    %24 = vector.extract_strided_slice %12 {offsets = [0, 128], sizes = [8, 128], strides = [1, 1]} : vector<8x384xf32> to vector<8x128xf32>
    %25 = arith.addf %23, %24 : vector<8x128xf32>
    %cst_12 = arith.constant 5.000000e-01 : f32
    %26 = vector.broadcast %cst_12 : f32 to vector<8x128xf32>
    %27 = arith.mulf %26, %25 : vector<8x128xf32>
    %28 = math.tanh %27 : vector<8x128xf32>
    %cst_13 = arith.constant 1.000000e+00 : f32
    %29 = vector.broadcast %cst_13 : f32 to vector<8x128xf32>
    %30 = arith.addf %29, %28 : vector<8x128xf32>
    %cst_14 = arith.constant 5.000000e-01 : f32
    %31 = vector.broadcast %cst_14 : f32 to vector<8x128xf32>
    %32 = arith.mulf %31, %30 : vector<8x128xf32>
    %33 = vector.extract_strided_slice %10 {offsets = [0, 256], sizes = [8, 128], strides = [1, 1]} : vector<8x384xf32> to vector<8x128xf32>
    %34 = vector.extract_strided_slice %12 {offsets = [0, 256], sizes = [8, 128], strides = [1, 1]} : vector<8x384xf32> to vector<8x128xf32>
    %35 = arith.addf %34, %6 : vector<8x128xf32>
    %36 = arith.mulf %22, %35 : vector<8x128xf32>
    %37 = arith.addf %33, %36 : vector<8x128xf32>
    %38 = math.tanh %37 : vector<8x128xf32>
    %cst_15 = arith.constant 1.000000e+00 : f32
    %39 = vector.broadcast %cst_15 : f32 to vector<8x128xf32>
    %40 = arith.subf %39, %32 : vector<8x128xf32>
    %41 = arith.mulf %40, %38 : vector<8x128xf32>
    %42 = arith.mulf %32, %7 : vector<8x128xf32>
    %43 = arith.addf %41, %42 : vector<8x128xf32>
    %44 = arith.index_cast %c0_i32_6 : i32 to index
    %c0_16 = arith.constant 0 : index
    %c0_17 = arith.constant 0 : index
    %45 = vector.load %arg5[%44, %c0_16, %c0_17] : memref<8x8x128xf32, #tpu.memory_space<vmem>>, vector<1x8x128xf32>
    %46 = vector.shape_cast %45 : vector<1x8x128xf32> to vector<8x128xf32>
    %47 = vector.shape_cast %43 : vector<8x128xf32> to vector<1x8x128xf32>
    tpu.vector_store %arg5[%44, %c0_16, %c0_17], %47 {strides = array<i32>} : memref<8x8x128xf32, #tpu.memory_space<vmem>>, vector<1x8x128xf32>,
    %c1_i32 = arith.constant 1 : i32
    %48 = arith.index_cast %c1_i32 : i32 to index
    %c0_18 = arith.constant 0 : index
    %c0_19 = arith.constant 0 : index
    %49 = vector.load %arg2[%48, %c0_18, %c0_19] : memref<8x8x384xf32, #tpu.memory_space<vmem>>, vector<1x8x384xf32>
    %50 = vector.shape_cast %49 : vector<1x8x384xf32> to vector<8x384xf32>
    %51 = arith.truncf %43 : vector<8x128xf32> to vector<8x128xbf16>
    %cst_20 = arith.constant dense<0.000000e+00> : vector<8x384xf32>
    %52 = tpu.matmul %51, %3, %cst_20 {dimension_numbers = #tpu.dot_dimension_numbers<[1], [0], [0], [1], [0, 0, 1, 1], [], []>} : vector<8x128xbf16>, vector<128x384xbf16>, vector<8x384xf32> -> vector<8x384xf32>
    %53 = vector.extract_strided_slice %50 {offsets = [0, 0], sizes = [8, 128], strides = [1, 1]} : vector<8x384xf32> to vector<8x128xf32>
    %54 = vector.extract_strided_slice %52 {offsets = [0, 0], sizes = [8, 128], strides = [1, 1]} : vector<8x384xf32> to vector<8x128xf32>
    %55 = arith.addf %53, %54 : vector<8x128xf32>
    %cst_21 = arith.constant 5.000000e-01 : f32
    %56 = vector.broadcast %cst_21 : f32 to vector<8x128xf32>
    %57 = arith.mulf %56, %55 : vector<8x128xf32>
    %58 = math.tanh %57 : vector<8x128xf32>
    %cst_22 = arith.constant 1.000000e+00 : f32
    %59 = vector.broadcast %cst_22 : f32 to vector<8x128xf32>
    %60 = arith.addf %59, %58 : vector<8x128xf32>
    %cst_23 = arith.constant 5.000000e-01 : f32
    %61 = vector.broadcast %cst_23 : f32 to vector<8x128xf32>
    %62 = arith.mulf %61, %60 : vector<8x128xf32>
    %63 = vector.extract_strided_slice %50 {offsets = [0, 128], sizes = [8, 128], strides = [1, 1]} : vector<8x384xf32> to vector<8x128xf32>
    %64 = vector.extract_strided_slice %52 {offsets = [0, 128], sizes = [8, 128], strides = [1, 1]} : vector<8x384xf32> to vector<8x128xf32>
    %65 = arith.addf %63, %64 : vector<8x128xf32>
    %cst_24 = arith.constant 5.000000e-01 : f32
    %66 = vector.broadcast %cst_24 : f32 to vector<8x128xf32>
    %67 = arith.mulf %66, %65 : vector<8x128xf32>
    %68 = math.tanh %67 : vector<8x128xf32>
    %cst_25 = arith.constant 1.000000e+00 : f32
    %69 = vector.broadcast %cst_25 : f32 to vector<8x128xf32>
    %70 = arith.addf %69, %68 : vector<8x128xf32>
    %cst_26 = arith.constant 5.000000e-01 : f32
    %71 = vector.broadcast %cst_26 : f32 to vector<8x128xf32>
    %72 = arith.mulf %71, %70 : vector<8x128xf32>
    %73 = vector.extract_strided_slice %50 {offsets = [0, 256], sizes = [8, 128], strides = [1, 1]} : vector<8x384xf32> to vector<8x128xf32>
    %74 = vector.extract_strided_slice %52 {offsets = [0, 256], sizes = [8, 128], strides = [1, 1]} : vector<8x384xf32> to vector<8x128xf32>
    %75 = arith.addf %74, %6 : vector<8x128xf32>
    %76 = arith.mulf %62, %75 : vector<8x128xf32>
    %77 = arith.addf %73, %76 : vector<8x128xf32>
    %78 = math.tanh %77 : vector<8x128xf32>
    %cst_27 = arith.constant 1.000000e+00 : f32
    %79 = vector.broadcast %cst_27 : f32 to vector<8x128xf32>
    %80 = arith.subf %79, %72 : vector<8x128xf32>
    %81 = arith.mulf %80, %78 : vector<8x128xf32>
    %82 = arith.mulf %72, %43 : vector<8x128xf32>
    %83 = arith.addf %81, %82 : vector<8x128xf32>
    %84 = arith.index_cast %c1_i32 : i32 to index
    %c0_28 = arith.constant 0 : index
    %c0_29 = arith.constant 0 : index
    %85 = vector.load %arg5[%84, %c0_28, %c0_29] : memref<8x8x128xf32, #tpu.memory_space<vmem>>, vector<1x8x128xf32>
    %86 = vector.shape_cast %85 : vector<1x8x128xf32> to vector<8x128xf32>
    %87 = vector.shape_cast %83 : vector<8x128xf32> to vector<1x8x128xf32>
    tpu.vector_store %arg5[%84, %c0_28, %c0_29], %87 {strides = array<i32>} : memref<8x8x128xf32, #tpu.memory_space<vmem>>, vector<1x8x128xf32>,
    %c2_i32 = arith.constant 2 : i32
    %88 = arith.index_cast %c2_i32 : i32 to index
    %c0_30 = arith.constant 0 : index
    %c0_31 = arith.constant 0 : index
    %89 = vector.load %arg2[%88, %c0_30, %c0_31] : memref<8x8x384xf32, #tpu.memory_space<vmem>>, vector<1x8x384xf32>
    %90 = vector.shape_cast %89 : vector<1x8x384xf32> to vector<8x384xf32>
    %91 = arith.truncf %83 : vector<8x128xf32> to vector<8x128xbf16>
    %cst_32 = arith.constant dense<0.000000e+00> : vector<8x384xf32>
    %92 = tpu.matmul %91, %3, %cst_32 {dimension_numbers = #tpu.dot_dimension_numbers<[1], [0], [0], [1], [0, 0, 1, 1], [], []>} : vector<8x128xbf16>, vector<128x384xbf16>, vector<8x384xf32> -> vector<8x384xf32>
    %93 = vector.extract_strided_slice %90 {offsets = [0, 0], sizes = [8, 128], strides = [1, 1]} : vector<8x384xf32> to vector<8x128xf32>
    %94 = vector.extract_strided_slice %92 {offsets = [0, 0], sizes = [8, 128], strides = [1, 1]} : vector<8x384xf32> to vector<8x128xf32>
    %95 = arith.addf %93, %94 : vector<8x128xf32>
    %cst_33 = arith.constant 5.000000e-01 : f32
    %96 = vector.broadcast %cst_33 : f32 to vector<8x128xf32>
    %97 = arith.mulf %96, %95 : vector<8x128xf32>
    %98 = math.tanh %97 : vector<8x128xf32>
    %cst_34 = arith.constant 1.000000e+00 : f32
    %99 = vector.broadcast %cst_34 : f32 to vector<8x128xf32>
    %100 = arith.addf %99, %98 : vector<8x128xf32>
    %cst_35 = arith.constant 5.000000e-01 : f32
    %101 = vector.broadcast %cst_35 : f32 to vector<8x128xf32>
    %102 = arith.mulf %101, %100 : vector<8x128xf32>
    %103 = vector.extract_strided_slice %90 {offsets = [0, 128], sizes = [8, 128], strides = [1, 1]} : vector<8x384xf32> to vector<8x128xf32>
    %104 = vector.extract_strided_slice %92 {offsets = [0, 128], sizes = [8, 128], strides = [1, 1]} : vector<8x384xf32> to vector<8x128xf32>
    %105 = arith.addf %103, %104 : vector<8x128xf32>
    %cst_36 = arith.constant 5.000000e-01 : f32
    %106 = vector.broadcast %cst_36 : f32 to vector<8x128xf32>
    %107 = arith.mulf %106, %105 : vector<8x128xf32>
    %108 = math.tanh %107 : vector<8x128xf32>
    %cst_37 = arith.constant 1.000000e+00 : f32
    %109 = vector.broadcast %cst_37 : f32 to vector<8x128xf32>
    %110 = arith.addf %109, %108 : vector<8x128xf32>
    %cst_38 = arith.constant 5.000000e-01 : f32
    %111 = vector.broadcast %cst_38 : f32 to vector<8x128xf32>
    %112 = arith.mulf %111, %110 : vector<8x128xf32>
    %113 = vector.extract_strided_slice %90 {offsets = [0, 256], sizes = [8, 128], strides = [1, 1]} : vector<8x384xf32> to vector<8x128xf32>
    %114 = vector.extract_strided_slice %92 {offsets = [0, 256], sizes = [8, 128], strides = [1, 1]} : vector<8x384xf32> to vector<8x128xf32>
    %115 = arith.addf %114, %6 : vector<8x128xf32>
    %116 = arith.mulf %102, %115 : vector<8x128xf32>
    %117 = arith.addf %113, %116 : vector<8x128xf32>
    %118 = math.tanh %117 : vector<8x128xf32>
    %cst_39 = arith.constant 1.000000e+00 : f32
    %119 = vector.broadcast %cst_39 : f32 to vector<8x128xf32>
    %120 = arith.subf %119, %112 : vector<8x128xf32>
    %121 = arith.mulf %120, %118 : vector<8x128xf32>
    %122 = arith.mulf %112, %83 : vector<8x128xf32>
    %123 = arith.addf %121, %122 : vector<8x128xf32>
    %124 = arith.index_cast %c2_i32 : i32 to index
    %c0_40 = arith.constant 0 : index
    %c0_41 = arith.constant 0 : index
    %125 = vector.load %arg5[%124, %c0_40, %c0_41] : memref<8x8x128xf32, #tpu.memory_space<vmem>>, vector<1x8x128xf32>
    %126 = vector.shape_cast %125 : vector<1x8x128xf32> to vector<8x128xf32>
    %127 = vector.shape_cast %123 : vector<8x128xf32> to vector<1x8x128xf32>
    tpu.vector_store %arg5[%124, %c0_40, %c0_41], %127 {strides = array<i32>} : memref<8x8x128xf32, #tpu.memory_space<vmem>>, vector<1x8x128xf32>,
    %c3_i32 = arith.constant 3 : i32
    %128 = arith.index_cast %c3_i32 : i32 to index
    %c0_42 = arith.constant 0 : index
    %c0_43 = arith.constant 0 : index
    %129 = vector.load %arg2[%128, %c0_42, %c0_43] : memref<8x8x384xf32, #tpu.memory_space<vmem>>, vector<1x8x384xf32>
    %130 = vector.shape_cast %129 : vector<1x8x384xf32> to vector<8x384xf32>
    %131 = arith.truncf %123 : vector<8x128xf32> to vector<8x128xbf16>
    %cst_44 = arith.constant dense<0.000000e+00> : vector<8x384xf32>
    %132 = tpu.matmul %131, %3, %cst_44 {dimension_numbers = #tpu.dot_dimension_numbers<[1], [0], [0], [1], [0, 0, 1, 1], [], []>} : vector<8x128xbf16>, vector<128x384xbf16>, vector<8x384xf32> -> vector<8x384xf32>
    %133 = vector.extract_strided_slice %130 {offsets = [0, 0], sizes = [8, 128], strides = [1, 1]} : vector<8x384xf32> to vector<8x128xf32>
    %134 = vector.extract_strided_slice %132 {offsets = [0, 0], sizes = [8, 128], strides = [1, 1]} : vector<8x384xf32> to vector<8x128xf32>
    %135 = arith.addf %133, %134 : vector<8x128xf32>
    %cst_45 = arith.constant 5.000000e-01 : f32
    %136 = vector.broadcast %cst_45 : f32 to vector<8x128xf32>
    %137 = arith.mulf %136, %135 : vector<8x128xf32>
    %138 = math.tanh %137 : vector<8x128xf32>
    %cst_46 = arith.constant 1.000000e+00 : f32
    %139 = vector.broadcast %cst_46 : f32 to vector<8x128xf32>
    %140 = arith.addf %139, %138 : vector<8x128xf32>
    %cst_47 = arith.constant 5.000000e-01 : f32
    %141 = vector.broadcast %cst_47 : f32 to vector<8x128xf32>
    %142 = arith.mulf %141, %140 : vector<8x128xf32>
    %143 = vector.extract_strided_slice %130 {offsets = [0, 128], sizes = [8, 128], strides = [1, 1]} : vector<8x384xf32> to vector<8x128xf32>
    %144 = vector.extract_strided_slice %132 {offsets = [0, 128], sizes = [8, 128], strides = [1, 1]} : vector<8x384xf32> to vector<8x128xf32>
    %145 = arith.addf %143, %144 : vector<8x128xf32>
    %cst_48 = arith.constant 5.000000e-01 : f32
    %146 = vector.broadcast %cst_48 : f32 to vector<8x128xf32>
    %147 = arith.mulf %146, %145 : vector<8x128xf32>
    %148 = math.tanh %147 : vector<8x128xf32>
    %cst_49 = arith.constant 1.000000e+00 : f32
    %149 = vector.broadcast %cst_49 : f32 to vector<8x128xf32>
    %150 = arith.addf %149, %148 : vector<8x128xf32>
    %cst_50 = arith.constant 5.000000e-01 : f32
    %151 = vector.broadcast %cst_50 : f32 to vector<8x128xf32>
    %152 = arith.mulf %151, %150 : vector<8x128xf32>
    %153 = vector.extract_strided_slice %130 {offsets = [0, 256], sizes = [8, 128], strides = [1, 1]} : vector<8x384xf32> to vector<8x128xf32>
    %154 = vector.extract_strided_slice %132 {offsets = [0, 256], sizes = [8, 128], strides = [1, 1]} : vector<8x384xf32> to vector<8x128xf32>
    %155 = arith.addf %154, %6 : vector<8x128xf32>
    %156 = arith.mulf %142, %155 : vector<8x128xf32>
    %157 = arith.addf %153, %156 : vector<8x128xf32>
    %158 = math.tanh %157 : vector<8x128xf32>
    %cst_51 = arith.constant 1.000000e+00 : f32
    %159 = vector.broadcast %cst_51 : f32 to vector<8x128xf32>
    %160 = arith.subf %159, %152 : vector<8x128xf32>
    %161 = arith.mulf %160, %158 : vector<8x128xf32>
    %162 = arith.mulf %152, %123 : vector<8x128xf32>
    %163 = arith.addf %161, %162 : vector<8x128xf32>
    %164 = arith.index_cast %c3_i32 : i32 to index
    %c0_52 = arith.constant 0 : index
    %c0_53 = arith.constant 0 : index
    %165 = vector.load %arg5[%164, %c0_52, %c0_53] : memref<8x8x128xf32, #tpu.memory_space<vmem>>, vector<1x8x128xf32>
    %166 = vector.shape_cast %165 : vector<1x8x128xf32> to vector<8x128xf32>
    %167 = vector.shape_cast %163 : vector<8x128xf32> to vector<1x8x128xf32>
    tpu.vector_store %arg5[%164, %c0_52, %c0_53], %167 {strides = array<i32>} : memref<8x8x128xf32, #tpu.memory_space<vmem>>, vector<1x8x128xf32>,
    %c4_i32 = arith.constant 4 : i32
    %168 = arith.index_cast %c4_i32 : i32 to index
    %c0_54 = arith.constant 0 : index
    %c0_55 = arith.constant 0 : index
    %169 = vector.load %arg2[%168, %c0_54, %c0_55] : memref<8x8x384xf32, #tpu.memory_space<vmem>>, vector<1x8x384xf32>
    %170 = vector.shape_cast %169 : vector<1x8x384xf32> to vector<8x384xf32>
    %171 = arith.truncf %163 : vector<8x128xf32> to vector<8x128xbf16>
    %cst_56 = arith.constant dense<0.000000e+00> : vector<8x384xf32>
    %172 = tpu.matmul %171, %3, %cst_56 {dimension_numbers = #tpu.dot_dimension_numbers<[1], [0], [0], [1], [0, 0, 1, 1], [], []>} : vector<8x128xbf16>, vector<128x384xbf16>, vector<8x384xf32> -> vector<8x384xf32>
    %173 = vector.extract_strided_slice %170 {offsets = [0, 0], sizes = [8, 128], strides = [1, 1]} : vector<8x384xf32> to vector<8x128xf32>
    %174 = vector.extract_strided_slice %172 {offsets = [0, 0], sizes = [8, 128], strides = [1, 1]} : vector<8x384xf32> to vector<8x128xf32>
    %175 = arith.addf %173, %174 : vector<8x128xf32>
    %cst_57 = arith.constant 5.000000e-01 : f32
    %176 = vector.broadcast %cst_57 : f32 to vector<8x128xf32>
    %177 = arith.mulf %176, %175 : vector<8x128xf32>
    %178 = math.tanh %177 : vector<8x128xf32>
    %cst_58 = arith.constant 1.000000e+00 : f32
    %179 = vector.broadcast %cst_58 : f32 to vector<8x128xf32>
    %180 = arith.addf %179, %178 : vector<8x128xf32>
    %cst_59 = arith.constant 5.000000e-01 : f32
    %181 = vector.broadcast %cst_59 : f32 to vector<8x128xf32>
    %182 = arith.mulf %181, %180 : vector<8x128xf32>
    %183 = vector.extract_strided_slice %170 {offsets = [0, 128], sizes = [8, 128], strides = [1, 1]} : vector<8x384xf32> to vector<8x128xf32>
    %184 = vector.extract_strided_slice %172 {offsets = [0, 128], sizes = [8, 128], strides = [1, 1]} : vector<8x384xf32> to vector<8x128xf32>
    %185 = arith.addf %183, %184 : vector<8x128xf32>
    %cst_60 = arith.constant 5.000000e-01 : f32
    %186 = vector.broadcast %cst_60 : f32 to vector<8x128xf32>
    %187 = arith.mulf %186, %185 : vector<8x128xf32>
    %188 = math.tanh %187 : vector<8x128xf32>
    %cst_61 = arith.constant 1.000000e+00 : f32
    %189 = vector.broadcast %cst_61 : f32 to vector<8x128xf32>
    %190 = arith.addf %189, %188 : vector<8x128xf32>
    %cst_62 = arith.constant 5.000000e-01 : f32
    %191 = vector.broadcast %cst_62 : f32 to vector<8x128xf32>
    %192 = arith.mulf %191, %190 : vector<8x128xf32>
    %193 = vector.extract_strided_slice %170 {offsets = [0, 256], sizes = [8, 128], strides = [1, 1]} : vector<8x384xf32> to vector<8x128xf32>
    %194 = vector.extract_strided_slice %172 {offsets = [0, 256], sizes = [8, 128], strides = [1, 1]} : vector<8x384xf32> to vector<8x128xf32>
    %195 = arith.addf %194, %6 : vector<8x128xf32>
    %196 = arith.mulf %182, %195 : vector<8x128xf32>
    %197 = arith.addf %193, %196 : vector<8x128xf32>
    %198 = math.tanh %197 : vector<8x128xf32>
    %cst_63 = arith.constant 1.000000e+00 : f32
    %199 = vector.broadcast %cst_63 : f32 to vector<8x128xf32>
    %200 = arith.subf %199, %192 : vector<8x128xf32>
    %201 = arith.mulf %200, %198 : vector<8x128xf32>
    %202 = arith.mulf %192, %163 : vector<8x128xf32>
    %203 = arith.addf %201, %202 : vector<8x128xf32>
    %204 = arith.index_cast %c4_i32 : i32 to index
    %c0_64 = arith.constant 0 : index
    %c0_65 = arith.constant 0 : index
    %205 = vector.load %arg5[%204, %c0_64, %c0_65] : memref<8x8x128xf32, #tpu.memory_space<vmem>>, vector<1x8x128xf32>
    %206 = vector.shape_cast %205 : vector<1x8x128xf32> to vector<8x128xf32>
    %207 = vector.shape_cast %203 : vector<8x128xf32> to vector<1x8x128xf32>
    tpu.vector_store %arg5[%204, %c0_64, %c0_65], %207 {strides = array<i32>} : memref<8x8x128xf32, #tpu.memory_space<vmem>>, vector<1x8x128xf32>,
    %c5_i32 = arith.constant 5 : i32
    %208 = arith.index_cast %c5_i32 : i32 to index
    %c0_66 = arith.constant 0 : index
    %c0_67 = arith.constant 0 : index
    %209 = vector.load %arg2[%208, %c0_66, %c0_67] : memref<8x8x384xf32, #tpu.memory_space<vmem>>, vector<1x8x384xf32>
    %210 = vector.shape_cast %209 : vector<1x8x384xf32> to vector<8x384xf32>
    %211 = arith.truncf %203 : vector<8x128xf32> to vector<8x128xbf16>
    %cst_68 = arith.constant dense<0.000000e+00> : vector<8x384xf32>
    %212 = tpu.matmul %211, %3, %cst_68 {dimension_numbers = #tpu.dot_dimension_numbers<[1], [0], [0], [1], [0, 0, 1, 1], [], []>} : vector<8x128xbf16>, vector<128x384xbf16>, vector<8x384xf32> -> vector<8x384xf32>
    %213 = vector.extract_strided_slice %210 {offsets = [0, 0], sizes = [8, 128], strides = [1, 1]} : vector<8x384xf32> to vector<8x128xf32>
    %214 = vector.extract_strided_slice %212 {offsets = [0, 0], sizes = [8, 128], strides = [1, 1]} : vector<8x384xf32> to vector<8x128xf32>
    %215 = arith.addf %213, %214 : vector<8x128xf32>
    %cst_69 = arith.constant 5.000000e-01 : f32
    %216 = vector.broadcast %cst_69 : f32 to vector<8x128xf32>
    %217 = arith.mulf %216, %215 : vector<8x128xf32>
    %218 = math.tanh %217 : vector<8x128xf32>
    %cst_70 = arith.constant 1.000000e+00 : f32
    %219 = vector.broadcast %cst_70 : f32 to vector<8x128xf32>
    %220 = arith.addf %219, %218 : vector<8x128xf32>
    %cst_71 = arith.constant 5.000000e-01 : f32
    %221 = vector.broadcast %cst_71 : f32 to vector<8x128xf32>
    %222 = arith.mulf %221, %220 : vector<8x128xf32>
    %223 = vector.extract_strided_slice %210 {offsets = [0, 128], sizes = [8, 128], strides = [1, 1]} : vector<8x384xf32> to vector<8x128xf32>
    %224 = vector.extract_strided_slice %212 {offsets = [0, 128], sizes = [8, 128], strides = [1, 1]} : vector<8x384xf32> to vector<8x128xf32>
    %225 = arith.addf %223, %224 : vector<8x128xf32>
    %cst_72 = arith.constant 5.000000e-01 : f32
    %226 = vector.broadcast %cst_72 : f32 to vector<8x128xf32>
    %227 = arith.mulf %226, %225 : vector<8x128xf32>
    %228 = math.tanh %227 : vector<8x128xf32>
    %cst_73 = arith.constant 1.000000e+00 : f32
    %229 = vector.broadcast %cst_73 : f32 to vector<8x128xf32>
    %230 = arith.addf %229, %228 : vector<8x128xf32>
    %cst_74 = arith.constant 5.000000e-01 : f32
    %231 = vector.broadcast %cst_74 : f32 to vector<8x128xf32>
    %232 = arith.mulf %231, %230 : vector<8x128xf32>
    %233 = vector.extract_strided_slice %210 {offsets = [0, 256], sizes = [8, 128], strides = [1, 1]} : vector<8x384xf32> to vector<8x128xf32>
    %234 = vector.extract_strided_slice %212 {offsets = [0, 256], sizes = [8, 128], strides = [1, 1]} : vector<8x384xf32> to vector<8x128xf32>
    %235 = arith.addf %234, %6 : vector<8x128xf32>
    %236 = arith.mulf %222, %235 : vector<8x128xf32>
    %237 = arith.addf %233, %236 : vector<8x128xf32>
    %238 = math.tanh %237 : vector<8x128xf32>
    %cst_75 = arith.constant 1.000000e+00 : f32
    %239 = vector.broadcast %cst_75 : f32 to vector<8x128xf32>
    %240 = arith.subf %239, %232 : vector<8x128xf32>
    %241 = arith.mulf %240, %238 : vector<8x128xf32>
    %242 = arith.mulf %232, %203 : vector<8x128xf32>
    %243 = arith.addf %241, %242 : vector<8x128xf32>
    %244 = arith.index_cast %c5_i32 : i32 to index
    %c0_76 = arith.constant 0 : index
    %c0_77 = arith.constant 0 : index
    %245 = vector.load %arg5[%244, %c0_76, %c0_77] : memref<8x8x128xf32, #tpu.memory_space<vmem>>, vector<1x8x128xf32>
    %246 = vector.shape_cast %245 : vector<1x8x128xf32> to vector<8x128xf32>
    %247 = vector.shape_cast %243 : vector<8x128xf32> to vector<1x8x128xf32>
    tpu.vector_store %arg5[%244, %c0_76, %c0_77], %247 {strides = array<i32>} : memref<8x8x128xf32, #tpu.memory_space<vmem>>, vector<1x8x128xf32>,
    %c6_i32 = arith.constant 6 : i32
    %248 = arith.index_cast %c6_i32 : i32 to index
    %c0_78 = arith.constant 0 : index
    %c0_79 = arith.constant 0 : index
    %249 = vector.load %arg2[%248, %c0_78, %c0_79] : memref<8x8x384xf32, #tpu.memory_space<vmem>>, vector<1x8x384xf32>
    %250 = vector.shape_cast %249 : vector<1x8x384xf32> to vector<8x384xf32>
    %251 = arith.truncf %243 : vector<8x128xf32> to vector<8x128xbf16>
    %cst_80 = arith.constant dense<0.000000e+00> : vector<8x384xf32>
    %252 = tpu.matmul %251, %3, %cst_80 {dimension_numbers = #tpu.dot_dimension_numbers<[1], [0], [0], [1], [0, 0, 1, 1], [], []>} : vector<8x128xbf16>, vector<128x384xbf16>, vector<8x384xf32> -> vector<8x384xf32>
    %253 = vector.extract_strided_slice %250 {offsets = [0, 0], sizes = [8, 128], strides = [1, 1]} : vector<8x384xf32> to vector<8x128xf32>
    %254 = vector.extract_strided_slice %252 {offsets = [0, 0], sizes = [8, 128], strides = [1, 1]} : vector<8x384xf32> to vector<8x128xf32>
    %255 = arith.addf %253, %254 : vector<8x128xf32>
    %cst_81 = arith.constant 5.000000e-01 : f32
    %256 = vector.broadcast %cst_81 : f32 to vector<8x128xf32>
    %257 = arith.mulf %256, %255 : vector<8x128xf32>
    %258 = math.tanh %257 : vector<8x128xf32>
    %cst_82 = arith.constant 1.000000e+00 : f32
    %259 = vector.broadcast %cst_82 : f32 to vector<8x128xf32>
    %260 = arith.addf %259, %258 : vector<8x128xf32>
    %cst_83 = arith.constant 5.000000e-01 : f32
    %261 = vector.broadcast %cst_83 : f32 to vector<8x128xf32>
    %262 = arith.mulf %261, %260 : vector<8x128xf32>
    %263 = vector.extract_strided_slice %250 {offsets = [0, 128], sizes = [8, 128], strides = [1, 1]} : vector<8x384xf32> to vector<8x128xf32>
    %264 = vector.extract_strided_slice %252 {offsets = [0, 128], sizes = [8, 128], strides = [1, 1]} : vector<8x384xf32> to vector<8x128xf32>
    %265 = arith.addf %263, %264 : vector<8x128xf32>
    %cst_84 = arith.constant 5.000000e-01 : f32
    %266 = vector.broadcast %cst_84 : f32 to vector<8x128xf32>
    %267 = arith.mulf %266, %265 : vector<8x128xf32>
    %268 = math.tanh %267 : vector<8x128xf32>
    %cst_85 = arith.constant 1.000000e+00 : f32
    %269 = vector.broadcast %cst_85 : f32 to vector<8x128xf32>
    %270 = arith.addf %269, %268 : vector<8x128xf32>
    %cst_86 = arith.constant 5.000000e-01 : f32
    %271 = vector.broadcast %cst_86 : f32 to vector<8x128xf32>
    %272 = arith.mulf %271, %270 : vector<8x128xf32>
    %273 = vector.extract_strided_slice %250 {offsets = [0, 256], sizes = [8, 128], strides = [1, 1]} : vector<8x384xf32> to vector<8x128xf32>
    %274 = vector.extract_strided_slice %252 {offsets = [0, 256], sizes = [8, 128], strides = [1, 1]} : vector<8x384xf32> to vector<8x128xf32>
    %275 = arith.addf %274, %6 : vector<8x128xf32>
    %276 = arith.mulf %262, %275 : vector<8x128xf32>
    %277 = arith.addf %273, %276 : vector<8x128xf32>
    %278 = math.tanh %277 : vector<8x128xf32>
    %cst_87 = arith.constant 1.000000e+00 : f32
    %279 = vector.broadcast %cst_87 : f32 to vector<8x128xf32>
    %280 = arith.subf %279, %272 : vector<8x128xf32>
    %281 = arith.mulf %280, %278 : vector<8x128xf32>
    %282 = arith.mulf %272, %243 : vector<8x128xf32>
    %283 = arith.addf %281, %282 : vector<8x128xf32>
    %284 = arith.index_cast %c6_i32 : i32 to index
    %c0_88 = arith.constant 0 : index
    %c0_89 = arith.constant 0 : index
    %285 = vector.load %arg5[%284, %c0_88, %c0_89] : memref<8x8x128xf32, #tpu.memory_space<vmem>>, vector<1x8x128xf32>
    %286 = vector.shape_cast %285 : vector<1x8x128xf32> to vector<8x128xf32>
    %287 = vector.shape_cast %283 : vector<8x128xf32> to vector<1x8x128xf32>
    tpu.vector_store %arg5[%284, %c0_88, %c0_89], %287 {strides = array<i32>} : memref<8x8x128xf32, #tpu.memory_space<vmem>>, vector<1x8x128xf32>,
    %c7_i32 = arith.constant 7 : i32
    %288 = arith.index_cast %c7_i32 : i32 to index
    %c0_90 = arith.constant 0 : index
    %c0_91 = arith.constant 0 : index
    %289 = vector.load %arg2[%288, %c0_90, %c0_91] : memref<8x8x384xf32, #tpu.memory_space<vmem>>, vector<1x8x384xf32>
    %290 = vector.shape_cast %289 : vector<1x8x384xf32> to vector<8x384xf32>
    %291 = arith.truncf %283 : vector<8x128xf32> to vector<8x128xbf16>
    %cst_92 = arith.constant dense<0.000000e+00> : vector<8x384xf32>
    %292 = tpu.matmul %291, %3, %cst_92 {dimension_numbers = #tpu.dot_dimension_numbers<[1], [0], [0], [1], [0, 0, 1, 1], [], []>} : vector<8x128xbf16>, vector<128x384xbf16>, vector<8x384xf32> -> vector<8x384xf32>
    %293 = vector.extract_strided_slice %290 {offsets = [0, 0], sizes = [8, 128], strides = [1, 1]} : vector<8x384xf32> to vector<8x128xf32>
    %294 = vector.extract_strided_slice %292 {offsets = [0, 0], sizes = [8, 128], strides = [1, 1]} : vector<8x384xf32> to vector<8x128xf32>
    %295 = arith.addf %293, %294 : vector<8x128xf32>
    %cst_93 = arith.constant 5.000000e-01 : f32
    %296 = vector.broadcast %cst_93 : f32 to vector<8x128xf32>
    %297 = arith.mulf %296, %295 : vector<8x128xf32>
    %298 = math.tanh %297 : vector<8x128xf32>
    %cst_94 = arith.constant 1.000000e+00 : f32
    %299 = vector.broadcast %cst_94 : f32 to vector<8x128xf32>
    %300 = arith.addf %299, %298 : vector<8x128xf32>
    %cst_95 = arith.constant 5.000000e-01 : f32
    %301 = vector.broadcast %cst_95 : f32 to vector<8x128xf32>
    %302 = arith.mulf %301, %300 : vector<8x128xf32>
    %303 = vector.extract_strided_slice %290 {offsets = [0, 128], sizes = [8, 128], strides = [1, 1]} : vector<8x384xf32> to vector<8x128xf32>
    %304 = vector.extract_strided_slice %292 {offsets = [0, 128], sizes = [8, 128], strides = [1, 1]} : vector<8x384xf32> to vector<8x128xf32>
    %305 = arith.addf %303, %304 : vector<8x128xf32>
    %cst_96 = arith.constant 5.000000e-01 : f32
    %306 = vector.broadcast %cst_96 : f32 to vector<8x128xf32>
    %307 = arith.mulf %306, %305 : vector<8x128xf32>
    %308 = math.tanh %307 : vector<8x128xf32>
    %cst_97 = arith.constant 1.000000e+00 : f32
    %309 = vector.broadcast %cst_97 : f32 to vector<8x128xf32>
    %310 = arith.addf %309, %308 : vector<8x128xf32>
    %cst_98 = arith.constant 5.000000e-01 : f32
    %311 = vector.broadcast %cst_98 : f32 to vector<8x128xf32>
    %312 = arith.mulf %311, %310 : vector<8x128xf32>
    %313 = vector.extract_strided_slice %290 {offsets = [0, 256], sizes = [8, 128], strides = [1, 1]} : vector<8x384xf32> to vector<8x128xf32>
    %314 = vector.extract_strided_slice %292 {offsets = [0, 256], sizes = [8, 128], strides = [1, 1]} : vector<8x384xf32> to vector<8x128xf32>
    %315 = arith.addf %314, %6 : vector<8x128xf32>
    %316 = arith.mulf %302, %315 : vector<8x128xf32>
    %317 = arith.addf %313, %316 : vector<8x128xf32>
    %318 = math.tanh %317 : vector<8x128xf32>
    %cst_99 = arith.constant 1.000000e+00 : f32
    %319 = vector.broadcast %cst_99 : f32 to vector<8x128xf32>
    %320 = arith.subf %319, %312 : vector<8x128xf32>
    %321 = arith.mulf %320, %318 : vector<8x128xf32>
    %322 = arith.mulf %312, %283 : vector<8x128xf32>
    %323 = arith.addf %321, %322 : vector<8x128xf32>
    %324 = arith.index_cast %c7_i32 : i32 to index
    %c0_100 = arith.constant 0 : index
    %c0_101 = arith.constant 0 : index
    %325 = vector.load %arg5[%324, %c0_100, %c0_101] : memref<8x8x128xf32, #tpu.memory_space<vmem>>, vector<1x8x128xf32>
    %326 = vector.shape_cast %325 : vector<1x8x128xf32> to vector<8x128xf32>
    %327 = vector.shape_cast %323 : vector<8x128xf32> to vector<1x8x128xf32>
    tpu.vector_store %arg5[%324, %c0_100, %c0_101], %327 {strides = array<i32>} : memref<8x8x128xf32, #tpu.memory_space<vmem>>, vector<1x8x128xf32>,
    %c8_i32 = arith.constant 8 : i32
    %c0_102 = arith.constant 0 : index
    %c0_103 = arith.constant 0 : index
    %328 = vector.load %arg6[%c0_102, %c0_103] : memref<8x128xf32, #tpu.memory_space<vmem>>, vector<8x128xf32>
    tpu.vector_store %arg6[%c0_102, %c0_103], %323 {strides = array<i32>} : memref<8x128xf32, #tpu.memory_space<vmem>>, vector<8x128xf32>,
    return
  }
  func.func @transform_0(%arg0: i32, %arg1: i32) -> (i32, i32, i32) {
    %c0_i32 = arith.constant 0 : i32
    %c0_i32_0 = arith.constant 0 : i32
    return %arg1, %arg0, %c0_i32 : i32, i32, i32
  }
  func.func @transform_1(%arg0: i32, %arg1: i32) -> (i32, i32) {
    %c0_i32 = arith.constant 0 : i32
    %c0_i32_0 = arith.constant 0 : i32
    %c0_i32_1 = arith.constant 0 : i32
    return %c0_i32, %c0_i32_0 : i32, i32
  }
  func.func @transform_2(%arg0: i32, %arg1: i32) -> (i32, i32) {
    %c0_i32 = arith.constant 0 : i32
    %c0_i32_0 = arith.constant 0 : i32
    %c0_i32_1 = arith.constant 0 : i32
    return %c0_i32, %c0_i32_0 : i32, i32
  }
  func.func @transform_3(%arg0: i32, %arg1: i32) -> (i32, i32, i32) {
    %c0_i32 = arith.constant 0 : i32
    %c0_i32_0 = arith.constant 0 : i32
    return %arg1, %arg0, %c0_i32 : i32, i32, i32
  }
}

</mosaic_0001>

<bundles_post_ra>
// kernel: tpu_custom_call.1
= control target key start
LH: loop header
LB: loop body
LE: loop exit
PB: predicated region body
PF: predicated region fallthrough
CT: control target
= control target key end

     0   :  { %8 = vsyncpa [#allocation4], 0  ;;  %s1950_s0 = inlined_call_operand.hbm [shape: f32[8,8,384], index: 0, kind: input, shape index: {}]   ;;  %s1951_s1 = inlined_call_operand.hbm [shape: bf16[128,384], index: 1, kind: input, shape index: {}]   ;;  %s1952_s2 = inlined_call_operand.vmem [shape: f32[1,128], index: 2, kind: input, shape index: {}]   ;;  %s1953_s3 = inlined_call_operand.hbm [shape: f32[8,8,128], index: 3, kind: output, shape index: {}]  }
   0x1   :  { %9 = vsyncpa [#allocation7], 0 }
   0x2   :  { %10 = vsyncpa [#allocation5], 0  ;;  %s1504_s12 = smov [#allocation3]   ;;  %s1432_s16 = scalar_lea.hbm %s1950_s0, 3072 }
   0x3   :  { %s16_s13 = sshll.u32 %s1504_s12, 4  ;;  %p1433_p0 = scmp.ne.s32.totalorder %s1950_s0, %s1432_s16  ;;  %s17_s13 = int_to_ptr.vmem [resolvable:$true] %s16_s13 }
   0x4   :  { %p1436_p1 = scmp.lt.u32.totalorder %s1432_s16, %s1950_s0 }
   0x6   :  { %p1438_p2 = pnand %p1436_p1, %p1433_p0 }
   0x8   :  { %1441 = shalt.err (!%p1438_p2)
}
   0x9   :  { %s1442_s21 = scalar_lea.vmem %s17_s13, 3072  ;;  %p1447_p4 = scmp.lt.s32.totalorder %s17_s13, %s17_s13 }
   0xa   :  { %p1443_p3 = scmp.ne.s32.totalorder %s17_s13, %s1442_s21  ;;  %p1448_p5 = scmp.lt.s32.totalorder %s1442_s21, %s1442_s21 }
   0xc   :  { %p1449_p6 = por %p1448_p5, %p1447_p4 }
   0xe   :  { %p1450_p7 = pnand %p1449_p6, %p1443_p3 }
  0x10   :  { %1453 = shalt.err (!%p1450_p7)
}
  0x11   :  { %s1505_s22 = smov 384   ;;  %s1506_s23 = smov 24  }
  0x12   :  { %22 = dma.hbm_to_vmem [thread:$0]  %s1950_s0, 3072, %s17_s13, [#allocation4], %s1505_s22, %s1505_s22, %s1506_s23  }
  0x13   :  { %s1507_s26 = smov [#allocation6]   ;;  %s1454_s30 = scalar_lea.hbm %s1951_s1, 3072 }
  0x14   :  { %s28_s27 = sshll.u32 %s1507_s26, 4  ;;  %p1455_p8 = scmp.ne.s32.totalorder %s1951_s1, %s1454_s30  ;;  %s29_s27 = int_to_ptr.vmem [resolvable:$true] %s28_s27 }
  0x15   :  { %p1458_p9 = scmp.lt.u32.totalorder %s1454_s30, %s1951_s1 }
  0x17   :  { %p1460_p10 = pnand %p1458_p9, %p1455_p8 }
  0x19   :  { %1463 = shalt.err (!%p1460_p10)
}
  0x1a   :  { %s1464_s8 = scalar_lea.vmem %s29_s27, 3072  ;;  %p1469_p12 = scmp.lt.s32.totalorder %s29_s27, %s29_s27 }
  0x1b   :  { %p1465_p11 = scmp.ne.s32.totalorder %s29_s27, %s1464_s8  ;;  %p1470_p13 = scmp.lt.s32.totalorder %s1464_s8, %s1464_s8 }
  0x1d   :  { %p1471_p0 = por %p1470_p13, %p1469_p12 }
  0x1f   :  { %p1472_p1 = pnand %p1471_p0, %p1465_p11 }
  0x21   :  { %1475 = shalt.err (!%p1472_p1)
}
  0x22   :  { %s1508_s0 = smov 192   ;;  %s1509_s9 = smov 12  }
  0x23   :  { %34 = dma.hbm_to_vmem [thread:$0]  %s1951_s1, 3072, %s29_s27, [#allocation7], %s1508_s0, %s1508_s0, %s1509_s9  }
  0x24   :  { %1498 = dma.done.wait [#allocation4], 3072  }
  0x25   :  { %1499 = vsyncadd [#allocation4], 4294964224 }
  0x26   :  { %1500 = dma.done.wait [#allocation7], 3072  }
  0x27   :  { %1501 = vsyncadd [#allocation7], 4294964224  ;;  %v1510_v0 = vmov 0.0   ;;  %v1511_v1 = vmov 0   ;;  %vm1512_vm0 = vmmov 0   ;;  %v1513_v26 = vmov 0.0|0.0  }
  0x28   :  { %1179 = vmatprep.subr.bf16.mxu1 %v1510_v0  ;;  %253 = vmatprep.mubr.bf16.mxu0 %v1511_v1  ;;  %v1565_v2 = vld [vmem:[#allocation6 + $0x4] ss:$12 sps:$4 sm:$0xff]   ;;  %v1567_v3 = vld [vmem:[#allocation6] ss:$12 sps:$4 sm:$0xff]   ;;  %v1570_v4 = vld [vmem:[#allocation6 + $0x1c] ss:$12 sps:$4 sm:$0xff]  }
  0x29   :  { %1195 = vmatprep.mubr.msk.bf16.mxu1 %vm1512_vm0, %v1510_v0  ;;  %221 = vmatprep.subr.bf16.mxu0 %v1565_v2  ;;  %v1573_v5 = vld [vmem:[#allocation6 + $0x18] ss:$12 sps:$4 sm:$0xff]   ;;  %v1576_v6 = vld [vmem:[#allocation6 + $0x34] ss:$12 sps:$4 sm:$0xff]   ;;  %v1581_v8 = vld [vmem:[#allocation6 + $0x30] ss:$12 sps:$4 sm:$0xff]  }
  0x2a   :  { %222 = vmatpush1.bf16.msra.mxu0 %v1567_v3  ;;  %v1578_v7 = vld [vmem:[#allocation6 + $0x8] ss:$12 sps:$4 sm:$0xff]   ;;  %v1583_v9 = vld [vmem:[#allocation6 + $0x4c] ss:$12 sps:$4 sm:$0xff]   ;;  %v1593_v12 = vld [vmem:[#allocation6 + $0x64] ss:$12 sps:$4 sm:$0xff]  }
  0x2b   :  { %223 = vmatprep.subr.bf16.mxu0 %v1570_v4  ;;  %1180 = vmatpush3.bf16.msra.mxu1 %v1578_v7  ;;  %v1587_v10 = vld [vmem:[#allocation6 + $0x20] ss:$12 sps:$4 sm:$0xff]   ;;  %v1590_v11 = vld [vmem:[#allocation6 + $0x48] ss:$12 sps:$4 sm:$0xff]   ;;  %v1597_v13 = vld [vmem:[#allocation6 + $0x38] ss:$12 sps:$4 sm:$0xff]  }
  0x2c   :  { %1181 = vmatprep.subr.bf16.mxu1 %v1510_v0  ;;  %v1600_v14 = vld [vmem:[#allocation6 + $0x60] ss:$12 sps:$4 sm:$0xff]   ;;  %v1603_v15 = vld [vmem:[#allocation6 + $0x7c] ss:$12 sps:$4 sm:$0xff]   ;;  %v1611_v17 = vld [vmem:[#allocation6 + $0x78] ss:$12 sps:$4 sm:$0xff]  }
  0x2d   :  { %v1607_v16 = vld [vmem:[#allocation6 + $0x50] ss:$12 sps:$4 sm:$0xff]   ;;  %v1614_v18 = vld [vmem:[#allocation6 + $0x94] ss:$12 sps:$4 sm:$0xff]   ;;  %v1624_v21 = vld [vmem:[#allocation6 + $0xac] ss:$12 sps:$4 sm:$0xff]  }
  0x2e   :  { %224 = vmatpush1.bf16.msra.mxu0 %v1573_v5  ;;  %v1617_v19 = vld [vmem:[#allocation6 + $0x68] ss:$12 sps:$4 sm:$0xff]   ;;  %v1621_v20 = vld [vmem:[#allocation6 + $0x90] ss:$12 sps:$4 sm:$0xff]   ;;  %v1627_v22 = vld [vmem:[#allocation6 + $0x80] ss:$12 sps:$4 sm:$0xff]  }
  0x2f   :  { %225 = vmatprep.subr.bf16.mxu0 %v1576_v6  ;;  %1182 = vmatpush3.bf16.msra.mxu1 %v1587_v10  ;;  %v1631_v23 = vld [vmem:[#allocation6 + $0xa8] ss:$12 sps:$4 sm:$0xff]   ;;  %v1635_v24 = vld [vmem:[#allocation6 + $0x98] ss:$12 sps:$4 sm:$0xff]   ;;  %v1640_v25 = vld [vmem:[#allocation6 + $0xb0] ss:$12 sps:$4 sm:$0xff]  }
  0x30   :  { %1183 = vmatprep.subr.bf16.mxu1 %v1510_v0  ;;  %v89_v27 = vld [vmem:[#allocation3] sm:$0xff]  ;;  %v90_v30 = vld [vmem:[#allocation3 + $0x8] sm:$0xff]  ;;  %v91_v46 = vld [vmem:[#allocation3 + $0x10] sm:$0xff] }
  0x31   :  { %v1684_v41 = vld [vmem:[%s1952_s2] ss:$0 sm:$0xff]  ;;  %v322_v58 = vld [vmem:[#allocation3 + $0x18] sm:$0xff]  ;;  %s1514_s2 = smov [#allocation8]  }
  0x32   :  { %226 = vmatpush1.bf16.msra.mxu0 %v1581_v8  ;;  %v323_v62 = vld [vmem:[#allocation3 + $0x20] sm:$0xff]  ;;  %s1069_s13 = sshll.u32 %s1514_s2, 4  ;;  %s1070_s13 = int_to_ptr.vmem [resolvable:$true] %s1069_s13 }
  0x33   :  { %227 = vmatprep.subr.bf16.mxu0 %v1583_v9  ;;  %1184 = vmatpush3.bf16.msra.mxu1 %v1597_v13  ;;  %s1476_s14 = scalar_lea.vmem %s1070_s13, 1024  ;;  %p1481_p3 = scmp.lt.s32.totalorder %s1070_s13, %s1070_s13 }
  0x34   :  { %1185 = vmatprep.subr.bf16.mxu1 %v1510_v0  ;;  %p1477_p2 = scmp.ne.s32.totalorder %s1070_s13, %s1476_s14  ;;  %p1482_p4 = scmp.lt.s32.totalorder %s1476_s14, %s1476_s14 }
  0x36   :  { %228 = vmatpush1.bf16.msra.mxu0 %v1590_v11  ;;  %p1483_p5 = por %p1482_p4, %p1481_p3 }
  0x37   :  { %229 = vmatprep.subr.bf16.mxu0 %v1593_v12  ;;  %1186 = vmatpush3.bf16.msra.mxu1 %v1607_v16 }
  0x38   :  { %1187 = vmatprep.subr.bf16.mxu1 %v1510_v0  ;;  %p1484_p6 = pnand %p1483_p5, %p1477_p2 }
  0x3a   :  { %230 = vmatpush1.bf16.msra.mxu0 %v1600_v14 }
  0x3b   :  { %231 = vmatprep.subr.bf16.mxu0 %v1603_v15  ;;  %1188 = vmatpush3.bf16.msra.mxu1 %v1617_v19 }
  0x3c   :  { %1189 = vmatprep.subr.bf16.mxu1 %v1510_v0 }
  0x3e   :  { %232 = vmatpush1.bf16.msra.mxu0 %v1611_v17 }
  0x3f   :  { %233 = vmatprep.subr.bf16.mxu0 %v1614_v18  ;;  %1190 = vmatpush3.bf16.msra.mxu1 %v1627_v22 }
  0x40   :  { %1191 = vmatprep.subr.bf16.mxu1 %v1510_v0 }
  0x42   :  { %234 = vmatpush1.bf16.msra.mxu0 %v1621_v20 }
  0x43   :  { %235 = vmatprep.subr.bf16.mxu0 %v1624_v21  ;;  %1192 = vmatpush3.bf16.msra.mxu1 %v1635_v24 }
  0x44   :  { %1193 = vmatprep.subr.bf16.mxu1 %v1510_v0 }
  0x46   :  { %236 = vmatpush1.bf16.msra.mxu0 %v1631_v23 }
  0x47   :  { %326 = vmatprep.subr.bf16.mxu0 %v1565_v2  ;;  %1194 = vmatpush3.bf16.msra.mxu1 %v1640_v25 }
  0x48   :  { %1199 = vmatprep.subr.bf16.mxu1 %v1510_v0 }
  0x49   :  { %254 = vmatmul.mubr.bf16.vlgmr.msra.gmra.mrb[0].mxu0 %v1513_v26 }
  0x4a   :  { %327 = vmatpush1.bf16.msra.mxu0 %v1567_v3  ;;  %358 = vmatprep.mubr.bf16.mxu0 %v1511_v1 }
  0x4b   :  { %328 = vmatprep.subr.bf16.mxu0 %v1570_v4  ;;  %1196 = vmatmul.mubr.bf16.vlgmr.msra.gmra.mrb[0].mxu1 %v1513_v26 }
  0x4c   :  { %1200 = vmatpush3.bf16.msra.mxu1 %v1578_v7  ;;  %1215 = vmatprep.mubr.msk.bf16.mxu1 %vm1512_vm0, %v1510_v0 }
  0x4d   :  { %1201 = vmatprep.subr.bf16.mxu1 %v1510_v0 }
  0x4e   :  { %329 = vmatpush1.bf16.msra.mxu0 %v1573_v5 }
  0x4f   :  { %330 = vmatprep.subr.bf16.mxu0 %v1576_v6 }
  0x50   :  { %1202 = vmatpush3.bf16.msra.mxu1 %v1587_v10 }
  0x51   :  { %1203 = vmatprep.subr.bf16.mxu1 %v1510_v0 }
  0x52   :  { %331 = vmatpush1.bf16.msra.mxu0 %v1581_v8 }
  0x53   :  { %332 = vmatprep.subr.bf16.mxu0 %v1583_v9 }
  0x54   :  { %1204 = vmatpush3.bf16.msra.mxu1 %v1597_v13 }
  0x55   :  { %1205 = vmatprep.subr.bf16.mxu1 %v1510_v0 }
  0x56   :  { %333 = vmatpush1.bf16.msra.mxu0 %v1590_v11 }
  0x57   :  { %334 = vmatprep.subr.bf16.mxu0 %v1593_v12 }
  0x58   :  { %1206 = vmatpush3.bf16.msra.mxu1 %v1607_v16 }
  0x59   :  { %1207 = vmatprep.subr.bf16.mxu1 %v1510_v0 }
  0x5a   :  { %335 = vmatpush1.bf16.msra.mxu0 %v1600_v14 }
  0x5b   :  { %336 = vmatprep.subr.bf16.mxu0 %v1603_v15 }
  0x5c   :  { %1208 = vmatpush3.bf16.msra.mxu1 %v1617_v19 }
  0x5d   :  { %1209 = vmatprep.subr.bf16.mxu1 %v1510_v0 }
  0x5e   :  { %337 = vmatpush1.bf16.msra.mxu0 %v1611_v17 }
  0x5f   :  { %338 = vmatprep.subr.bf16.mxu0 %v1614_v18 }
  0x60   :  { %1210 = vmatpush3.bf16.msra.mxu1 %v1627_v22 }
  0x61   :  { %1211 = vmatprep.subr.bf16.mxu1 %v1510_v0 }
  0x62   :  { %339 = vmatpush1.bf16.msra.mxu0 %v1621_v20 }
  0x63   :  { %340 = vmatprep.subr.bf16.mxu0 %v1624_v21 }
  0x64   :  { %1212 = vmatpush3.bf16.msra.mxu1 %v1635_v24 }
  0x65   :  { %1213 = vmatprep.subr.bf16.mxu1 %v1510_v0 }
  0x66   :  { %341 = vmatpush1.bf16.msra.mxu0 %v1631_v23 }
  0x67   :  { %432 = vmatprep.subr.bf16.mxu0 %v1565_v2 }
  0x68   :  { %1214 = vmatpush3.bf16.msra.mxu1 %v1640_v25 }
  0x69   :  { %1219 = vmatprep.subr.bf16.mxu1 %v1510_v0 }
 0x11c   :  { %v255_v28 = vpop.f32.mrb[0].mxu0 }
 0x11d   :  { %v302_v29 = vadd.f32 %v255_v28, %v89_v27  ;;  %v257_v31 = vpop.f32.mrb[1].mxu0 }
 0x11e   :  { %v259_v32 = vpop.f32.mrb[2].mxu0  ;;  %v307_v35 = vadd.f32 %v257_v31, %v90_v30  ;;  %v296_v36 = vpop.f32.mrb[0].mxu1 }
 0x11f   :  { %v303_v33 = vmul.f32 0.5, %v302_v29  ;;  %v260_v34 = vpop.f32.mrb[3].mxu0  ;;  %v1197_v37 = vpop.f32.mrb[1].mxu1  ;;  %v312_v44 = vadd.f32 %v1684_v41, %v296_v36 }
 0x120   :  { %v299_v38 = vpop.f32.mrb[2].mxu1  ;;  %v308_v39 = vmul.f32 0.5, %v307_v35 }
 0x121   :  { %1384 = vtanh.f32 %v303_v33  ;;  %v1198_v40 = vpop.f32.mrb[3].mxu1  ;;  %v324_v38 = vld [vmem:[#allocation3 + $0x28] sm:$0xff] }
 0x122   :  { %1386 = vtanh.f32 %v308_v39 }
 0x12b   :  { %v1385_v42 = vpop.eup %1384 }
 0x12c   :  { %v305_v43 = vadd.f32 1.0, %v1385_v42  ;;  %v1387_v48 = vpop.eup %1386 }
 0x12d   :  { %v310_v50 = vadd.f32 1.0, %v1387_v48 }
 0x12e   :  { %v306_v45 = vmul.f32 0.5, %v305_v43 }
 0x12f   :  { %v311_v51 = vmul.f32 0.5, %v310_v50 }
 0x130   :  { %v313_v47 = vmul.f32 %v312_v44, %v306_v45 }
 0x131   :  { %v316_v52 = vsub.f32 1.0, %v311_v51  ;;  %v318_v54 = vmul.f32 0.0, %v311_v51  ;;  %v428_v51 = vld [vmem:[#allocation3 + $0x30] sm:$0xff] }
 0x132   :  { %v314_v49 = vadd.f32 %v313_v47, %v91_v46 }
 0x134   :  { %1388 = vtanh.f32 %v314_v49 }
 0x13e   :  { %v1389_v53 = vpop.eup %1388 }
 0x13f   :  { %v317_v55 = vmul.f32 %v1389_v53, %v316_v52 }
 0x141   :  { %v1687_v56 = vadd.f32 %v318_v54, %v317_v55  ;;  %v429_v55 = vld [vmem:[#allocation3 + $0x38] sm:$0xff] }
 0x143   :  { %320 = vst [vmem:[#allocation8] sm:$0xff] %v1687_v56  ;;  %v325_v57 = vpack.c.bf16 %v1687_v56, %v1687_v56 }
 0x145   :  { %359 = vmatmul.mubr.bf16.vlgmr.msra.gmra.mrb[4].mxu0 %v325_v57  ;;  %1216 = vmatmul.mubr.bf16.vlgmr.msra.gmra.mrb[4].mxu1 %v325_v57 }
 0x146   :  { %433 = vmatpush1.bf16.msra.mxu0 %v1567_v3  ;;  %1220 = vmatpush3.bf16.msra.mxu1 %v1578_v7 }
 0x147   :  { %434 = vmatprep.subr.bf16.mxu0 %v1570_v4  ;;  %1221 = vmatprep.subr.bf16.mxu1 %v1510_v0 }
 0x148   :  { %464 = vmatprep.mubr.bf16.mxu0 %v1511_v1  ;;  %1235 = vmatprep.mubr.msk.bf16.mxu1 %vm1512_vm0, %v1510_v0 }
 0x14a   :  { %435 = vmatpush1.bf16.msra.mxu0 %v1573_v5  ;;  %1222 = vmatpush3.bf16.msra.mxu1 %v1587_v10 }
 0x14b   :  { %436 = vmatprep.subr.bf16.mxu0 %v1576_v6  ;;  %1223 = vmatprep.subr.bf16.mxu1 %v1510_v0 }
 0x14e   :  { %437 = vmatpush1.bf16.msra.mxu0 %v1581_v8  ;;  %1224 = vmatpush3.bf16.msra.mxu1 %v1597_v13 }
 0x14f   :  { %438 = vmatprep.subr.bf16.mxu0 %v1583_v9  ;;  %1225 = vmatprep.subr.bf16.mxu1 %v1510_v0 }
 0x152   :  { %439 = vmatpush1.bf16.msra.mxu0 %v1590_v11  ;;  %1226 = vmatpush3.bf16.msra.mxu1 %v1607_v16 }
 0x153   :  { %440 = vmatprep.subr.bf16.mxu0 %v1593_v12  ;;  %1227 = vmatprep.subr.bf16.mxu1 %v1510_v0 }
 0x156   :  { %441 = vmatpush1.bf16.msra.mxu0 %v1600_v14  ;;  %1228 = vmatpush3.bf16.msra.mxu1 %v1617_v19 }
 0x157   :  { %442 = vmatprep.subr.bf16.mxu0 %v1603_v15  ;;  %1229 = vmatprep.subr.bf16.mxu1 %v1510_v0 }
 0x15a   :  { %443 = vmatpush1.bf16.msra.mxu0 %v1611_v17  ;;  %1230 = vmatpush3.bf16.msra.mxu1 %v1627_v22 }
 0x15b   :  { %444 = vmatprep.subr.bf16.mxu0 %v1614_v18  ;;  %1231 = vmatprep.subr.bf16.mxu1 %v1510_v0 }
 0x15e   :  { %445 = vmatpush1.bf16.msra.mxu0 %v1621_v20  ;;  %1232 = vmatpush3.bf16.msra.mxu1 %v1635_v24 }
 0x15f   :  { %446 = vmatprep.subr.bf16.mxu0 %v1624_v21  ;;  %1233 = vmatprep.subr.bf16.mxu1 %v1510_v0 }
 0x162   :  { %447 = vmatpush1.bf16.msra.mxu0 %v1631_v23  ;;  %1234 = vmatpush3.bf16.msra.mxu1 %v1640_v25 }
 0x163   :  { %538 = vmatprep.subr.bf16.mxu0 %v1565_v2  ;;  %1239 = vmatprep.subr.bf16.mxu1 %v1510_v0 }
 0x218   :  { %v360_v59 = vpop.f32.mrb[4].mxu0  ;;  %v401_v60 = vpop.f32.mrb[4].mxu1 }
 0x219   :  { %v407_v61 = vadd.f32 %v360_v59, %v322_v58  ;;  %v362_v63 = vpop.f32.mrb[5].mxu0  ;;  %v1217_v26 = vpop.f32.mrb[5].mxu1  ;;  %v417_v37 = vadd.f32 %v1684_v41, %v401_v60 }
 0x21a   :  { %v364_v27 = vpop.f32.mrb[6].mxu0  ;;  %v404_v28 = vpop.f32.mrb[6].mxu1  ;;  %v412_v32 = vadd.f32 %v362_v63, %v323_v62 }
 0x21b   :  { %v408_v29 = vmul.f32 0.5, %v407_v61  ;;  %v365_v30 = vpop.f32.mrb[7].mxu0  ;;  %v1218_v31 = vpop.f32.mrb[7].mxu1 }
 0x21c   :  { %v413_v33 = vmul.f32 0.5, %v412_v32  ;;  %v430_v31 = vld [vmem:[#allocation3 + $0x40] sm:$0xff] }
 0x21d   :  { %1390 = vtanh.f32 %v408_v29 }
 0x21e   :  { %1392 = vtanh.f32 %v413_v33 }
 0x227   :  { %v1391_v34 = vpop.eup %1390 }
 0x228   :  { %v410_v35 = vadd.f32 1.0, %v1391_v34  ;;  %v1393_v40 = vpop.eup %1392 }
 0x229   :  { %v415_v43 = vadd.f32 1.0, %v1393_v40 }
 0x22a   :  { %v411_v36 = vmul.f32 0.5, %v410_v35 }
 0x22b   :  { %v416_v44 = vmul.f32 0.5, %v415_v43 }
 0x22c   :  { %v418_v39 = vmul.f32 %v417_v37, %v411_v36 }
 0x22d   :  { %v421_v45 = vsub.f32 1.0, %v416_v44  ;;  %v423_v48 = vmul.f32 %v416_v44, %v1687_v56  ;;  %v534_v44 = vld [vmem:[#allocation3 + $0x48] sm:$0xff] }
 0x22e   :  { %v419_v42 = vadd.f32 %v418_v39, %v324_v38 }
 0x230   :  { %1394 = vtanh.f32 %v419_v42 }
 0x23a   :  { %v1395_v46 = vpop.eup %1394 }
 0x23b   :  { %v422_v47 = vmul.f32 %v1395_v46, %v421_v45 }
 0x23d   :  { %v1729_v49 = vadd.f32 %v423_v48, %v422_v47  ;;  %v535_v48 = vld [vmem:[#allocation3 + $0x50] sm:$0xff] }
 0x23f   :  { %426 = vst [vmem:[#allocation8 + $0x8] sm:$0xff] %v1729_v49  ;;  %v431_v50 = vpack.c.bf16 %v1729_v49, %v1729_v49 }
 0x241   :  { %465 = vmatmul.mubr.bf16.vlgmr.msra.gmra.mrb[8].mxu0 %v431_v50  ;;  %1236 = vmatmul.mubr.bf16.vlgmr.msra.gmra.mrb[8].mxu1 %v431_v50 }
 0x242   :  { %539 = vmatpush1.bf16.msra.mxu0 %v1567_v3  ;;  %1240 = vmatpush3.bf16.msra.mxu1 %v1578_v7 }
 0x243   :  { %540 = vmatprep.subr.bf16.mxu0 %v1570_v4  ;;  %1241 = vmatprep.subr.bf16.mxu1 %v1510_v0 }
 0x244   :  { %570 = vmatprep.mubr.bf16.mxu0 %v1511_v1  ;;  %1255 = vmatprep.mubr.msk.bf16.mxu1 %vm1512_vm0, %v1510_v0 }
 0x246   :  { %541 = vmatpush1.bf16.msra.mxu0 %v1573_v5  ;;  %1242 = vmatpush3.bf16.msra.mxu1 %v1587_v10 }
 0x247   :  { %542 = vmatprep.subr.bf16.mxu0 %v1576_v6  ;;  %1243 = vmatprep.subr.bf16.mxu1 %v1510_v0 }
 0x24a   :  { %543 = vmatpush1.bf16.msra.mxu0 %v1581_v8  ;;  %1244 = vmatpush3.bf16.msra.mxu1 %v1597_v13 }
 0x24b   :  { %544 = vmatprep.subr.bf16.mxu0 %v1583_v9  ;;  %1245 = vmatprep.subr.bf16.mxu1 %v1510_v0 }
 0x24e   :  { %545 = vmatpush1.bf16.msra.mxu0 %v1590_v11  ;;  %1246 = vmatpush3.bf16.msra.mxu1 %v1607_v16 }
 0x24f   :  { %546 = vmatprep.subr.bf16.mxu0 %v1593_v12  ;;  %1247 = vmatprep.subr.bf16.mxu1 %v1510_v0 }
 0x252   :  { %547 = vmatpush1.bf16.msra.mxu0 %v1600_v14  ;;  %1248 = vmatpush3.bf16.msra.mxu1 %v1617_v19 }
 0x253   :  { %548 = vmatprep.subr.bf16.mxu0 %v1603_v15  ;;  %1249 = vmatprep.subr.bf16.mxu1 %v1510_v0 }
 0x256   :  { %549 = vmatpush1.bf16.msra.mxu0 %v1611_v17  ;;  %1250 = vmatpush3.bf16.msra.mxu1 %v1627_v22 }
 0x257   :  { %550 = vmatprep.subr.bf16.mxu0 %v1614_v18  ;;  %1251 = vmatprep.subr.bf16.mxu1 %v1510_v0 }
 0x25a   :  { %551 = vmatpush1.bf16.msra.mxu0 %v1621_v20  ;;  %1252 = vmatpush3.bf16.msra.mxu1 %v1635_v24 }
 0x25b   :  { %552 = vmatprep.subr.bf16.mxu0 %v1624_v21  ;;  %1253 = vmatprep.subr.bf16.mxu1 %v1510_v0 }
 0x25e   :  { %553 = vmatpush1.bf16.msra.mxu0 %v1631_v23  ;;  %1254 = vmatpush3.bf16.msra.mxu1 %v1640_v25 }
 0x25f   :  { %644 = vmatprep.subr.bf16.mxu0 %v1565_v2  ;;  %1259 = vmatprep.subr.bf16.mxu1 %v1510_v0 }
 0x314   :  { %v466_v52 = vpop.f32.mrb[8].mxu0  ;;  %v507_v53 = vpop.f32.mrb[8].mxu1 }
 0x315   :  { %v513_v54 = vadd.f32 %v466_v52, %v428_v51  ;;  %v468_v56 = vpop.f32.mrb[9].mxu0  ;;  %v1237_v57 = vpop.f32.mrb[9].mxu1  ;;  %v523_v30 = vadd.f32 %v1684_v41, %v507_v53 }
 0x316   :  { %v470_v58 = vpop.f32.mrb[10].mxu0  ;;  %v510_v59 = vpop.f32.mrb[10].mxu1  ;;  %v518_v63 = vadd.f32 %v468_v56, %v429_v55 }
 0x317   :  { %v514_v60 = vmul.f32 0.5, %v513_v54  ;;  %v471_v61 = vpop.f32.mrb[11].mxu0  ;;  %v1238_v62 = vpop.f32.mrb[11].mxu1 }
 0x318   :  { %v519_v26 = vmul.f32 0.5, %v518_v63  ;;  %v536_v62 = vld [vmem:[#allocation3 + $0x58] sm:$0xff] }
 0x319   :  { %1396 = vtanh.f32 %v514_v60 }
 0x31a   :  { %1398 = vtanh.f32 %v519_v26 }
 0x323   :  { %v1397_v27 = vpop.eup %1396 }
 0x324   :  { %v516_v28 = vadd.f32 1.0, %v1397_v27  ;;  %v1399_v33 = vpop.eup %1398 }
 0x325   :  { %v521_v35 = vadd.f32 1.0, %v1399_v33 }
 0x326   :  { %v517_v29 = vmul.f32 0.5, %v516_v28 }
 0x327   :  { %v522_v36 = vmul.f32 0.5, %v521_v35 }
 0x328   :  { %v524_v32 = vmul.f32 %v523_v30, %v517_v29 }
 0x329   :  { %v527_v37 = vsub.f32 1.0, %v522_v36  ;;  %v529_v40 = vmul.f32 %v522_v36, %v1729_v49  ;;  %v640_v36 = vld [vmem:[#allocation3 + $0x60] sm:$0xff] }
 0x32a   :  { %v525_v34 = vadd.f32 %v524_v32, %v430_v31 }
 0x32c   :  { %1400 = vtanh.f32 %v525_v34 }
 0x336   :  { %v1401_v38 = vpop.eup %1400 }
 0x337   :  { %v528_v39 = vmul.f32 %v1401_v38, %v527_v37 }
 0x339   :  { %v1771_v42 = vadd.f32 %v529_v40, %v528_v39  ;;  %v641_v40 = vld [vmem:[#allocation3 + $0x68] sm:$0xff] }
 0x33b   :  { %532 = vst [vmem:[#allocation8 + $0x10] sm:$0xff] %v1771_v42  ;;  %v537_v43 = vpack.c.bf16 %v1771_v42, %v1771_v42 }
 0x33d   :  { %571 = vmatmul.mubr.bf16.vlgmr.msra.gmra.mrb[12].mxu0 %v537_v43  ;;  %1256 = vmatmul.mubr.bf16.vlgmr.msra.gmra.mrb[12].mxu1 %v537_v43 }
 0x33e   :  { %645 = vmatpush1.bf16.msra.mxu0 %v1567_v3  ;;  %1260 = vmatpush3.bf16.msra.mxu1 %v1578_v7 }
 0x33f   :  { %646 = vmatprep.subr.bf16.mxu0 %v1570_v4  ;;  %1261 = vmatprep.subr.bf16.mxu1 %v1510_v0 }
 0x340   :  { %676 = vmatprep.mubr.bf16.mxu0 %v1511_v1  ;;  %1275 = vmatprep.mubr.msk.bf16.mxu1 %vm1512_vm0, %v1510_v0 }
 0x342   :  { %647 = vmatpush1.bf16.msra.mxu0 %v1573_v5  ;;  %1262 = vmatpush3.bf16.msra.mxu1 %v1587_v10 }
 0x343   :  { %648 = vmatprep.subr.bf16.mxu0 %v1576_v6  ;;  %1263 = vmatprep.subr.bf16.mxu1 %v1510_v0 }
 0x346   :  { %649 = vmatpush1.bf16.msra.mxu0 %v1581_v8  ;;  %1264 = vmatpush3.bf16.msra.mxu1 %v1597_v13 }
 0x347   :  { %650 = vmatprep.subr.bf16.mxu0 %v1583_v9  ;;  %1265 = vmatprep.subr.bf16.mxu1 %v1510_v0 }
 0x34a   :  { %651 = vmatpush1.bf16.msra.mxu0 %v1590_v11  ;;  %1266 = vmatpush3.bf16.msra.mxu1 %v1607_v16 }
 0x34b   :  { %652 = vmatprep.subr.bf16.mxu0 %v1593_v12  ;;  %1267 = vmatprep.subr.bf16.mxu1 %v1510_v0 }
 0x34e   :  { %653 = vmatpush1.bf16.msra.mxu0 %v1600_v14  ;;  %1268 = vmatpush3.bf16.msra.mxu1 %v1617_v19 }
 0x34f   :  { %654 = vmatprep.subr.bf16.mxu0 %v1603_v15  ;;  %1269 = vmatprep.subr.bf16.mxu1 %v1510_v0 }
 0x352   :  { %655 = vmatpush1.bf16.msra.mxu0 %v1611_v17  ;;  %1270 = vmatpush3.bf16.msra.mxu1 %v1627_v22 }
 0x353   :  { %656 = vmatprep.subr.bf16.mxu0 %v1614_v18  ;;  %1271 = vmatprep.subr.bf16.mxu1 %v1510_v0 }
 0x356   :  { %657 = vmatpush1.bf16.msra.mxu0 %v1621_v20  ;;  %1272 = vmatpush3.bf16.msra.mxu1 %v1635_v24 }
 0x357   :  { %658 = vmatprep.subr.bf16.mxu0 %v1624_v21  ;;  %1273 = vmatprep.subr.bf16.mxu1 %v1510_v0 }
 0x35a   :  { %659 = vmatpush1.bf16.msra.mxu0 %v1631_v23  ;;  %1274 = vmatpush3.bf16.msra.mxu1 %v1640_v25 }
 0x35b   :  { %750 = vmatprep.subr.bf16.mxu0 %v1565_v2  ;;  %1279 = vmatprep.subr.bf16.mxu1 %v1510_v0 }
 0x410   :  { %v572_v45 = vpop.f32.mrb[12].mxu0  ;;  %v613_v46 = vpop.f32.mrb[12].mxu1 }
 0x411   :  { %v619_v47 = vadd.f32 %v572_v45, %v534_v44  ;;  %v574_v49 = vpop.f32.mrb[13].mxu0  ;;  %v1257_v50 = vpop.f32.mrb[13].mxu1  ;;  %v629_v61 = vadd.f32 %v1684_v41, %v613_v46 }
 0x412   :  { %v576_v51 = vpop.f32.mrb[14].mxu0  ;;  %v616_v52 = vpop.f32.mrb[14].mxu1  ;;  %v624_v56 = vadd.f32 %v574_v49, %v535_v48 }
 0x413   :  { %v620_v53 = vmul.f32 0.5, %v619_v47  ;;  %v577_v54 = vpop.f32.mrb[15].mxu0  ;;  %v1258_v55 = vpop.f32.mrb[15].mxu1 }
 0x414   :  { %v625_v57 = vmul.f32 0.5, %v624_v56  ;;  %v642_v55 = vld [vmem:[#allocation3 + $0x70] sm:$0xff] }
 0x415   :  { %1402 = vtanh.f32 %v620_v53 }
 0x416   :  { %1404 = vtanh.f32 %v625_v57 }
 0x41f   :  { %v1403_v58 = vpop.eup %1402 }
 0x420   :  { %v622_v59 = vadd.f32 1.0, %v1403_v58  ;;  %v1405_v26 = vpop.eup %1404 }
 0x421   :  { %v627_v28 = vadd.f32 1.0, %v1405_v26 }
 0x422   :  { %v623_v60 = vmul.f32 0.5, %v622_v59 }
 0x423   :  { %v628_v29 = vmul.f32 0.5, %v627_v28 }
 0x424   :  { %v630_v63 = vmul.f32 %v629_v61, %v623_v60 }
 0x425   :  { %v633_v30 = vsub.f32 1.0, %v628_v29  ;;  %v635_v33 = vmul.f32 %v628_v29, %v1771_v42  ;;  %v746_v29 = vld [vmem:[#allocation3 + $0x78] sm:$0xff] }
 0x426   :  { %v631_v27 = vadd.f32 %v630_v63, %v536_v62 }
 0x428   :  { %1406 = vtanh.f32 %v631_v27 }
 0x432   :  { %v1407_v31 = vpop.eup %1406 }
 0x433   :  { %v634_v32 = vmul.f32 %v1407_v31, %v633_v30 }
 0x435   :  { %v1813_v34 = vadd.f32 %v635_v33, %v634_v32  ;;  %v747_v33 = vld [vmem:[#allocation3 + $0x80] sm:$0xff] }
 0x437   :  { %638 = vst [vmem:[#allocation8 + $0x18] sm:$0xff] %v1813_v34  ;;  %v643_v35 = vpack.c.bf16 %v1813_v34, %v1813_v34 }
 0x439   :  { %677 = vmatmul.mubr.bf16.vlgmr.msra.gmra.mrb[16].mxu0 %v643_v35  ;;  %1276 = vmatmul.mubr.bf16.vlgmr.msra.gmra.mrb[16].mxu1 %v643_v35 }
 0x43a   :  { %751 = vmatpush1.bf16.msra.mxu0 %v1567_v3  ;;  %1280 = vmatpush3.bf16.msra.mxu1 %v1578_v7 }
 0x43b   :  { %752 = vmatprep.subr.bf16.mxu0 %v1570_v4  ;;  %1281 = vmatprep.subr.bf16.mxu1 %v1510_v0 }
 0x43c   :  { %782 = vmatprep.mubr.bf16.mxu0 %v1511_v1  ;;  %1295 = vmatprep.mubr.msk.bf16.mxu1 %vm1512_vm0, %v1510_v0 }
 0x43e   :  { %753 = vmatpush1.bf16.msra.mxu0 %v1573_v5  ;;  %1282 = vmatpush3.bf16.msra.mxu1 %v1587_v10 }
 0x43f   :  { %754 = vmatprep.subr.bf16.mxu0 %v1576_v6  ;;  %1283 = vmatprep.subr.bf16.mxu1 %v1510_v0 }
 0x442   :  { %755 = vmatpush1.bf16.msra.mxu0 %v1581_v8  ;;  %1284 = vmatpush3.bf16.msra.mxu1 %v1597_v13 }
 0x443   :  { %756 = vmatprep.subr.bf16.mxu0 %v1583_v9  ;;  %1285 = vmatprep.subr.bf16.mxu1 %v1510_v0 }
 0x446   :  { %757 = vmatpush1.bf16.msra.mxu0 %v1590_v11  ;;  %1286 = vmatpush3.bf16.msra.mxu1 %v1607_v16 }
 0x447   :  { %758 = vmatprep.subr.bf16.mxu0 %v1593_v12  ;;  %1287 = vmatprep.subr.bf16.mxu1 %v1510_v0 }
 0x44a   :  { %759 = vmatpush1.bf16.msra.mxu0 %v1600_v14  ;;  %1288 = vmatpush3.bf16.msra.mxu1 %v1617_v19 }
 0x44b   :  { %760 = vmatprep.subr.bf16.mxu0 %v1603_v15  ;;  %1289 = vmatprep.subr.bf16.mxu1 %v1510_v0 }
 0x44e   :  { %761 = vmatpush1.bf16.msra.mxu0 %v1611_v17  ;;  %1290 = vmatpush3.bf16.msra.mxu1 %v1627_v22 }
 0x44f   :  { %762 = vmatprep.subr.bf16.mxu0 %v1614_v18  ;;  %1291 = vmatprep.subr.bf16.mxu1 %v1510_v0 }
 0x452   :  { %763 = vmatpush1.bf16.msra.mxu0 %v1621_v20  ;;  %1292 = vmatpush3.bf16.msra.mxu1 %v1635_v24 }
 0x453   :  { %764 = vmatprep.subr.bf16.mxu0 %v1624_v21  ;;  %1293 = vmatprep.subr.bf16.mxu1 %v1510_v0 }
 0x456   :  { %765 = vmatpush1.bf16.msra.mxu0 %v1631_v23  ;;  %1294 = vmatpush3.bf16.msra.mxu1 %v1640_v25 }
 0x457   :  { %856 = vmatprep.subr.bf16.mxu0 %v1565_v2  ;;  %1299 = vmatprep.subr.bf16.mxu1 %v1510_v0 }
 0x50c   :  { %v678_v37 = vpop.f32.mrb[16].mxu0  ;;  %v719_v38 = vpop.f32.mrb[16].mxu1 }
 0x50d   :  { %v725_v39 = vadd.f32 %v678_v37, %v640_v36  ;;  %v680_v42 = vpop.f32.mrb[17].mxu0  ;;  %v1277_v43 = vpop.f32.mrb[17].mxu1  ;;  %v735_v54 = vadd.f32 %v1684_v41, %v719_v38 }
 0x50e   :  { %v682_v44 = vpop.f32.mrb[18].mxu0  ;;  %v722_v45 = vpop.f32.mrb[18].mxu1  ;;  %v730_v49 = vadd.f32 %v680_v42, %v641_v40 }
 0x50f   :  { %v726_v46 = vmul.f32 0.5, %v725_v39  ;;  %v683_v47 = vpop.f32.mrb[19].mxu0  ;;  %v1278_v48 = vpop.f32.mrb[19].mxu1 }
 0x510   :  { %v731_v50 = vmul.f32 0.5, %v730_v49  ;;  %v748_v47 = vld [vmem:[#allocation3 + $0x88] sm:$0xff] }
 0x511   :  { %1408 = vtanh.f32 %v726_v46 }
 0x512   :  { %1410 = vtanh.f32 %v731_v50 }
 0x51b   :  { %v1409_v51 = vpop.eup %1408 }
 0x51c   :  { %v728_v52 = vadd.f32 1.0, %v1409_v51  ;;  %v1411_v57 = vpop.eup %1410 }
 0x51d   :  { %v733_v59 = vadd.f32 1.0, %v1411_v57 }
 0x51e   :  { %v729_v53 = vmul.f32 0.5, %v728_v52 }
 0x51f   :  { %v734_v60 = vmul.f32 0.5, %v733_v59 }
 0x520   :  { %v736_v56 = vmul.f32 %v735_v54, %v729_v53 }
 0x521   :  { %v739_v61 = vsub.f32 1.0, %v734_v60  ;;  %v741_v26 = vmul.f32 %v734_v60, %v1813_v34 }
 0x522   :  { %v737_v58 = vadd.f32 %v736_v56, %v642_v55 }
 0x524   :  { %1412 = vtanh.f32 %v737_v58 }
 0x52e   :  { %v1413_v62 = vpop.eup %1412 }
 0x52f   :  { %v740_v63 = vmul.f32 %v1413_v62, %v739_v61 }
 0x531   :  { %v1855_v27 = vadd.f32 %v741_v26, %v740_v63  ;;  %v958_v26 = vld [vmem:[#allocation3 + $0xa8] sm:$0xff] }
 0x533   :  { %744 = vst [vmem:[#allocation8 + $0x20] sm:$0xff] %v1855_v27  ;;  %v749_v28 = vpack.c.bf16 %v1855_v27, %v1855_v27 }
 0x535   :  { %783 = vmatmul.mubr.bf16.vlgmr.msra.gmra.mrb[20].mxu0 %v749_v28  ;;  %1296 = vmatmul.mubr.bf16.vlgmr.msra.gmra.mrb[20].mxu1 %v749_v28 }
 0x536   :  { %857 = vmatpush1.bf16.msra.mxu0 %v1567_v3  ;;  %1300 = vmatpush3.bf16.msra.mxu1 %v1578_v7 }
 0x537   :  { %858 = vmatprep.subr.bf16.mxu0 %v1570_v4  ;;  %1301 = vmatprep.subr.bf16.mxu1 %v1510_v0 }
 0x538   :  { %888 = vmatprep.mubr.bf16.mxu0 %v1511_v1  ;;  %1315 = vmatprep.mubr.msk.bf16.mxu1 %vm1512_vm0, %v1510_v0 }
 0x53a   :  { %859 = vmatpush1.bf16.msra.mxu0 %v1573_v5  ;;  %1302 = vmatpush3.bf16.msra.mxu1 %v1587_v10 }
 0x53b   :  { %860 = vmatprep.subr.bf16.mxu0 %v1576_v6  ;;  %1303 = vmatprep.subr.bf16.mxu1 %v1510_v0 }
 0x53e   :  { %861 = vmatpush1.bf16.msra.mxu0 %v1581_v8  ;;  %1304 = vmatpush3.bf16.msra.mxu1 %v1597_v13 }
 0x53f   :  { %862 = vmatprep.subr.bf16.mxu0 %v1583_v9  ;;  %1305 = vmatprep.subr.bf16.mxu1 %v1510_v0 }
 0x542   :  { %863 = vmatpush1.bf16.msra.mxu0 %v1590_v11  ;;  %1306 = vmatpush3.bf16.msra.mxu1 %v1607_v16 }
 0x543   :  { %864 = vmatprep.subr.bf16.mxu0 %v1593_v12  ;;  %1307 = vmatprep.subr.bf16.mxu1 %v1510_v0 }
 0x546   :  { %865 = vmatpush1.bf16.msra.mxu0 %v1600_v14  ;;  %1308 = vmatpush3.bf16.msra.mxu1 %v1617_v19 }
 0x547   :  { %866 = vmatprep.subr.bf16.mxu0 %v1603_v15  ;;  %1309 = vmatprep.subr.bf16.mxu1 %v1510_v0 }
 0x54a   :  { %867 = vmatpush1.bf16.msra.mxu0 %v1611_v17  ;;  %1310 = vmatpush3.bf16.msra.mxu1 %v1627_v22 }
 0x54b   :  { %868 = vmatprep.subr.bf16.mxu0 %v1614_v18  ;;  %1311 = vmatprep.subr.bf16.mxu1 %v1510_v0 }
 0x54e   :  { %869 = vmatpush1.bf16.msra.mxu0 %v1621_v20  ;;  %1312 = vmatpush3.bf16.msra.mxu1 %v1635_v24 }
 0x54f   :  { %870 = vmatprep.subr.bf16.mxu0 %v1624_v21  ;;  %1313 = vmatprep.subr.bf16.mxu1 %v1510_v0 }
 0x552   :  { %871 = vmatpush1.bf16.msra.mxu0 %v1631_v23  ;;  %1314 = vmatpush3.bf16.msra.mxu1 %v1640_v25 }
 0x553   :  { %962 = vmatprep.subr.bf16.mxu0 %v1565_v2  ;;  %1319 = vmatprep.subr.bf16.mxu1 %v1510_v0 }
 0x608   :  { %v784_v30 = vpop.f32.mrb[20].mxu0  ;;  %v825_v31 = vpop.f32.mrb[20].mxu1 }
 0x609   :  { %v831_v32 = vadd.f32 %v784_v30, %v746_v29  ;;  %v786_v34 = vpop.f32.mrb[21].mxu0  ;;  %v1297_v35 = vpop.f32.mrb[21].mxu1  ;;  %v841_v46 = vadd.f32 %v1684_v41, %v825_v31  ;;  %v959_v30 = vld [vmem:[#allocation3 + $0xb0] sm:$0xff] }
 0x60a   :  { %v788_v36 = vpop.f32.mrb[22].mxu0  ;;  %v828_v37 = vpop.f32.mrb[22].mxu1  ;;  %v836_v42 = vadd.f32 %v786_v34, %v747_v33 }
 0x60b   :  { %v832_v38 = vmul.f32 0.5, %v831_v32  ;;  %v789_v39 = vpop.f32.mrb[23].mxu0  ;;  %v1298_v40 = vpop.f32.mrb[23].mxu1 }
 0x60c   :  { %v837_v43 = vmul.f32 0.5, %v836_v42 }
 0x60d   :  { %1414 = vtanh.f32 %v832_v38 }
 0x60e   :  { %1416 = vtanh.f32 %v837_v43 }
 0x617   :  { %v1415_v44 = vpop.eup %1414 }
 0x618   :  { %v834_v2 = vadd.f32 1.0, %v1415_v44  ;;  %v1417_v49 = vpop.eup %1416 }
 0x619   :  { %v839_v51 = vadd.f32 1.0, %v1417_v49 }
 0x61a   :  { %v835_v45 = vmul.f32 0.5, %v834_v2  ;;  %v960_v2 = vld [vmem:[#allocation3 + $0xb8] sm:$0xff] }
 0x61b   :  { %v840_v52 = vmul.f32 0.5, %v839_v51 }
 0x61c   :  { %v842_v48 = vmul.f32 %v841_v46, %v835_v45 }
 0x61d   :  { %v845_v53 = vsub.f32 1.0, %v840_v52  ;;  %v847_v56 = vmul.f32 %v840_v52, %v1855_v27 }
 0x61e   :  { %v843_v50 = vadd.f32 %v842_v48, %v748_v47 }
 0x620   :  { %1418 = vtanh.f32 %v843_v50 }
 0x62a   :  { %v1419_v54 = vpop.eup %1418 }
 0x62b   :  { %v846_v55 = vmul.f32 %v1419_v54, %v845_v53 }
 0x62d   :  { %v1897_v57 = vadd.f32 %v847_v56, %v846_v55 }
 0x62f   :  { %850 = vst [vmem:[#allocation8 + $0x28] sm:$0xff] %v1897_v57  ;;  %v855_v58 = vpack.c.bf16 %v1897_v57, %v1897_v57 }
 0x631   :  { %889 = vmatmul.mubr.bf16.vlgmr.msra.gmra.mrb[24].mxu0 %v855_v58  ;;  %1316 = vmatmul.mubr.bf16.vlgmr.msra.gmra.mrb[24].mxu1 %v855_v58 }
 0x632   :  { %963 = vmatpush1.bf16.msra.mxu0 %v1567_v3  ;;  %1320 = vmatpush3.bf16.msra.mxu1 %v1578_v7 }
 0x633   :  { %964 = vmatprep.subr.bf16.mxu0 %v1570_v4  ;;  %1321 = vmatprep.subr.bf16.mxu1 %v1510_v0 }
 0x634   :  { %994 = vmatprep.mubr.bf16.mxu0 %v1511_v1  ;;  %1335 = vmatprep.mubr.msk.bf16.mxu1 %vm1512_vm0, %v1510_v0  ;;  %v852_v1 = vld [vmem:[#allocation3 + $0x90] sm:$0xff] }
 0x636   :  { %965 = vmatpush1.bf16.msra.mxu0 %v1573_v5  ;;  %1322 = vmatpush3.bf16.msra.mxu1 %v1587_v10 }
 0x637   :  { %966 = vmatprep.subr.bf16.mxu0 %v1576_v6  ;;  %1323 = vmatprep.subr.bf16.mxu1 %v1510_v0  ;;  %v853_v6 = vld [vmem:[#allocation3 + $0x98] sm:$0xff] }
 0x63a   :  { %967 = vmatpush1.bf16.msra.mxu0 %v1581_v8  ;;  %1324 = vmatpush3.bf16.msra.mxu1 %v1597_v13 }
 0x63b   :  { %968 = vmatprep.subr.bf16.mxu0 %v1583_v9  ;;  %1325 = vmatprep.subr.bf16.mxu1 %v1510_v0 }
 0x63e   :  { %969 = vmatpush1.bf16.msra.mxu0 %v1590_v11  ;;  %1326 = vmatpush3.bf16.msra.mxu1 %v1607_v16 }
 0x63f   :  { %970 = vmatprep.subr.bf16.mxu0 %v1593_v12  ;;  %1327 = vmatprep.subr.bf16.mxu1 %v1510_v0 }
 0x642   :  { %971 = vmatpush1.bf16.msra.mxu0 %v1600_v14  ;;  %1328 = vmatpush3.bf16.msra.mxu1 %v1617_v19  ;;  %v854_v19 = vld [vmem:[#allocation3 + $0xa0] sm:$0xff] }
 0x643   :  { %972 = vmatprep.subr.bf16.mxu0 %v1603_v15  ;;  %1329 = vmatprep.subr.bf16.mxu1 %v1510_v0 }
 0x646   :  { %973 = vmatpush1.bf16.msra.mxu0 %v1611_v17  ;;  %1330 = vmatpush3.bf16.msra.mxu1 %v1627_v22 }
 0x647   :  { %974 = vmatprep.subr.bf16.mxu0 %v1614_v18  ;;  %1331 = vmatprep.subr.bf16.mxu1 %v1510_v0 }
 0x64a   :  { %975 = vmatpush1.bf16.msra.mxu0 %v1621_v20  ;;  %1332 = vmatpush3.bf16.msra.mxu1 %v1635_v24 }
 0x64b   :  { %976 = vmatprep.subr.bf16.mxu0 %v1624_v21  ;;  %1333 = vmatprep.subr.bf16.mxu1 %v1510_v0 }
 0x64e   :  { %977 = vmatpush1.bf16.msra.mxu0 %v1631_v23  ;;  %1334 = vmatpush3.bf16.msra.mxu1 %v1640_v25 }
 0x704   :  { %v890_v3 = vpop.f32.mrb[24].mxu0  ;;  %v931_v4 = vpop.f32.mrb[24].mxu1 }
 0x705   :  { %v937_v5 = vadd.f32 %v890_v3, %v852_v1  ;;  %v892_v7 = vpop.f32.mrb[25].mxu0  ;;  %v1317_v8 = vpop.f32.mrb[25].mxu1  ;;  %v947_v18 = vadd.f32 %v1684_v41, %v931_v4 }
 0x706   :  { %v894_v9 = vpop.f32.mrb[26].mxu0  ;;  %v934_v10 = vpop.f32.mrb[26].mxu1  ;;  %v942_v14 = vadd.f32 %v892_v7, %v853_v6 }
 0x707   :  { %v938_v11 = vmul.f32 0.5, %v937_v5  ;;  %v895_v12 = vpop.f32.mrb[27].mxu0  ;;  %v1318_v13 = vpop.f32.mrb[27].mxu1 }
 0x708   :  { %v943_v15 = vmul.f32 0.5, %v942_v14 }
 0x709   :  { %1420 = vtanh.f32 %v938_v11 }
 0x70a   :  { %1422 = vtanh.f32 %v943_v15 }
 0x713   :  { %v1421_v0 = vpop.eup %1420 }
 0x714   :  { %v940_v16 = vadd.f32 1.0, %v1421_v0  ;;  %v1423_v21 = vpop.eup %1422 }
 0x715   :  { %v945_v23 = vadd.f32 1.0, %v1423_v21 }
 0x716   :  { %v941_v17 = vmul.f32 0.5, %v940_v16 }
 0x717   :  { %v946_v24 = vmul.f32 0.5, %v945_v23 }
 0x718   :  { %v948_v20 = vmul.f32 %v947_v18, %v941_v17 }
 0x719   :  { %v951_v25 = vsub.f32 1.0, %v946_v24  ;;  %v953_v61 = vmul.f32 %v946_v24, %v1897_v57 }
 0x71a   :  { %v949_v22 = vadd.f32 %v948_v20, %v854_v19 }
 0x71c   :  { %1424 = vtanh.f32 %v949_v22 }
 0x726   :  { %v1425_v59 = vpop.eup %1424 }
 0x727   :  { %v952_v60 = vmul.f32 %v1425_v59, %v951_v25 }
 0x729   :  { %v954_v62 = vadd.f32 %v953_v61, %v952_v60 }
 0x72b   :  { %956 = vst [vmem:[#allocation8 + $0x30] sm:$0xff] %v954_v62  ;;  %v961_v63 = vpack.c.bf16 %v954_v62, %v954_v62 }
 0x72d   :  { %995 = vmatmul.mubr.bf16.vlgmr.msra.gmra.mrb[28].mxu0 %v961_v63  ;;  %1336 = vmatmul.mubr.bf16.vlgmr.msra.gmra.mrb[28].mxu1 %v961_v63 }
 0x800   :  { %v996_v27 = vpop.f32.mrb[28].mxu0  ;;  %v1037_v28 = vpop.f32.mrb[28].mxu1 }
 0x801   :  { %v1043_v29 = vadd.f32 %v996_v27, %v958_v26  ;;  %v998_v31 = vpop.f32.mrb[29].mxu0  ;;  %v1337_v32 = vpop.f32.mrb[29].mxu1  ;;  %v1053_v44 = vadd.f32 %v1684_v41, %v1037_v28 }
 0x802   :  { %v1000_v33 = vpop.f32.mrb[30].mxu0  ;;  %v1040_v34 = vpop.f32.mrb[30].mxu1  ;;  %v1048_v38 = vadd.f32 %v998_v31, %v959_v30 }
 0x803   :  { %v1044_v35 = vmul.f32 0.5, %v1043_v29  ;;  %v1001_v36 = vpop.f32.mrb[31].mxu0  ;;  %v1338_v37 = vpop.f32.mrb[31].mxu1 }
 0x804   :  { %v1049_v39 = vmul.f32 0.5, %v1048_v38 }
 0x805   :  { %1426 = vtanh.f32 %v1044_v35 }
 0x806   :  { %1428 = vtanh.f32 %v1049_v39 }
 0x80f   :  { %v1427_v40 = vpop.eup %1426 }
 0x810   :  { %v1046_v42 = vadd.f32 1.0, %v1427_v40  ;;  %v1429_v46 = vpop.eup %1428 }
 0x811   :  { %v1051_v48 = vadd.f32 1.0, %v1429_v46 }
 0x812   :  { %v1047_v43 = vmul.f32 0.5, %v1046_v42 }
 0x813   :  { %v1052_v49 = vmul.f32 0.5, %v1051_v48 }
 0x814   :  { %v1054_v45 = vmul.f32 %v1053_v44, %v1047_v43 }
 0x815   :  { %v1057_v50 = vsub.f32 1.0, %v1052_v49  ;;  %v1059_v53 = vmul.f32 %v1052_v49, %v954_v62 }
 0x816   :  { %v1055_v47 = vadd.f32 %v1054_v45, %v960_v2 }
 0x818   :  { %1430 = vtanh.f32 %v1055_v47 }
 0x822   :  { %v1431_v51 = vpop.eup %1430 }
 0x823   :  { %v1058_v52 = vmul.f32 %v1431_v51, %v1057_v50 }
 0x825   :  { %v1060_v54 = vadd.f32 %v1059_v53, %v1058_v52 }
 0x827   :  { %1062 = vst [vmem:[#allocation8 + $0x38] sm:$0xff] %v1060_v54 }
 0x828   :  { %1487 = shalt.err (!%p1484_p6)
}
 0x829   :  { %s1488_s17 = scalar_lea.hbm %s1953_s3, 1024 }
 0x82a   :  { %p1489_p7 = scmp.ne.s32.totalorder %s1953_s3, %s1488_s17  ;;  %p1492_p8 = scmp.lt.u32.totalorder %s1488_s17, %s1953_s3 }
 0x82c   :  { %p1494_p9 = pnand %p1492_p8, %p1489_p7 }
 0x82e   :  { %1497 = shalt.err (!%p1494_p9)
}
 0x82f   :  { %s1515_s22 = smov 128   ;;  %s1516_s23 = smov 8  }
 0x830   :  { %1075 = dma.vmem_to_hbm [thread:$0]  %s1070_s13, 1024, %s1953_s3, [#allocation5], %s1515_s22, %s1515_s22, %s1516_s23  }
 0x831   :  { %1502 = dma.done.wait [#allocation5], 1024  }
 0x832   :  { %1503 = vsyncadd [#allocation5], 4294966272 }
 0x833   :  { %1079 = vsyncpa [#allocation4], 1 }
 0x834   :  { %1080 = vsyncpa [#allocation7], 1 }
 0x835   :  { %1081 = vsyncpa [#allocation5], 1 }

</bundles_post_ra>
